<compile_context>
chip_gen: v7x
topology: tpu7x:2x2x1
jax: 0.10.0
libtpu: 0.0.40
codegen_flags: <defaults>
</compile_context>

<pallas_src>
import functools

import jax
import jax.numpy as jnp
from jax import lax
from jax.experimental import pallas as pl
from jax.experimental.pallas import tpu as pltpu


# --------------------------------------------------------------------------
# Fused Pallas kernel: both propagations + all loss math, one launch.
# --------------------------------------------------------------------------

def _ciegcl_fused_kernel(users_ref, pos_ref, neg_ref,        # SMEM (B,) int32
                         graph_ref, ue_ref, ie_ref,          # VMEM bf16
                         out_ref,                            # VMEM (1,1) f32
                         *, n_layers, temp, cl_weight):
    f32 = jnp.float32
    bf16 = jnp.bfloat16

    U, I = graph_ref.shape
    D = ue_ref.shape[1]
    B = users_ref.shape[0]

    g = graph_ref[...]            # (U, I) bf16
    ue0 = ue_ref[...]             # (U, D) bf16
    ie0 = ie_ref[...]             # (I, D) bf16

    inv_layers = 1.0 / float(n_layers + 1)
    inv_temp = 1.0 / float(temp)
    inv_b = 1.0 / float(B)

    def propagate(gmat):
        # Transpose once per propagation; gmat_t is dead as soon as this
        # function returns, so it is never live across the other propagation.
        gmat_t = jnp.transpose(gmat)                        # (I, U) bf16
        u_prev, i_prev = ue0, ie0
        u_sum = ue0.astype(f32)
        i_sum = ie0.astype(f32)
        for _ in range(n_layers):                           # static unroll
            u_new = jnp.dot(gmat, i_prev, preferred_element_type=f32)
            i_new = jnp.dot(gmat_t, u_prev, preferred_element_type=f32)
            u_sum = u_sum + u_new
            i_sum = i_sum + i_new
            u_prev = u_new.astype(bf16)                     # bf16 feeds MXU
            i_prev = i_new.astype(bf16)
        return u_sum * inv_layers, i_sum * inv_layers       # f32

    # ---- propagation over the full graph first (shrinks peak live set) ----
    user_e, item_e = propagate(g)

    # ---- one-hot selectors built in-kernel from the SMEM index scalars ----
    def one_hot(idx_ref, n):
        col = lax.broadcasted_iota(jnp.int32, (1, n), 1)
        rows = [(col == idx_ref[b]).astype(f32) for b in range(B)]
        return jnp.concatenate(rows, axis=0)                # (B, n) f32

    oh_u = one_hot(users_ref, U).astype(bf16)               # (B, U)
    oh_p = one_hot(pos_ref, I).astype(bf16)                 # (B, I)
    oh_n = one_hot(neg_ref, I).astype(bf16)                 # (B, I)

    # ---- sampled-edge mask + "inter" graph, then second propagation ----
    # mask[u,i] = 1 iff (u,i) is a sampled (user, positive) pair; duplicate
    # samples collapse to 1 via the minimum (matches csr bool->int semantics).
    edge_cnt = lax.dot_general(oh_u, oh_p, (((0,), (0,)), ((), ())),
                               preferred_element_type=f32)  # (U, I)
    mask = jnp.minimum(edge_cnt, 1.0).astype(bf16)
    g_inter = g - g * mask     # exact in bf16: mask entries are exactly 0 / 1
    iu_e, ii_e = propagate(g_inter)

    # ---- single bf16 cast of the propagated embeddings for the MXU ----
    user_e_b, item_e_b = user_e.astype(bf16), item_e.astype(bf16)
    iu_e_b, ii_e_b = iu_e.astype(bf16), ii_e.astype(bf16)

    # ---- batched one-hot gathers: 2 matmuls instead of 5 ----
    gu = jnp.dot(oh_u, jnp.concatenate([user_e_b, iu_e_b], axis=1),
                 preferred_element_type=f32)                # (B, 2D)
    u_u, iu_u = gu[:, :D], gu[:, D:]
    gi = jnp.dot(jnp.concatenate([oh_p, oh_n], axis=0),
                 jnp.concatenate([item_e_b, ii_e_b], axis=1),
                 preferred_element_type=f32)                # (2B, 2D)
    i_p, i_n, ii_n = gi[:B, :D], gi[B:, :D], gi[B:, D:]

    # ---- contrastive negative score: one fused (2B, U+I) score matmul ----
    q = jnp.concatenate([iu_u, ii_n], axis=0).astype(bf16)      # (2B, D)
    all_nodes = jnp.concatenate([user_e_b, item_e_b], axis=0)   # (U+I, D)
    s = lax.dot_general(q, all_nodes, (((1,), (1,)), ((), ())),
                        preferred_element_type=f32) * inv_temp  # (2B, U+I)
    row = lax.broadcasted_iota(jnp.int32, (2 * B, U + I), 0)
    col = lax.broadcasted_iota(jnp.int32, (2 * B, U + I), 1)
    u_row = row < B
    u_col = col < U
    valid = (u_row & u_col) | (~u_row & ~u_col)                 # block-diag
    s = jnp.where(valid, s, -1e30)
    # Max-shifted logsumexp with the shift clamped at 0: exactly equivalent to
    # log(sum_j exp(s_ij) + 1e-8) but cannot overflow for large scores.
    m = jnp.maximum(jnp.max(s, axis=-1, keepdims=True), 0.0)
    lse = m + jnp.log(jnp.sum(jnp.exp(s - m), axis=-1, keepdims=True)
                      + 1e-8 * jnp.exp(-m))                     # (2B, 1)
    # rows [0,B) -> user term, rows [B,2B) -> item term; sum/B == sum of means
    neg_score = jnp.sum(lse, axis=0, keepdims=True) * inv_b     # (1, 1)

    # ---- contrastive positive score ----
    pos_pair = jnp.concatenate([iu_u * u_u, ii_n * i_n], axis=0)  # (2B, D)
    pos = jnp.clip(jnp.sum(pos_pair, axis=-1, keepdims=True) * inv_temp,
                   -5.0, 5.0)                                     # (2B, 1)
    pos_score = jnp.sum(pos, axis=0, keepdims=True) * inv_b       # (1, 1)

    loss_cl = neg_score - pos_score

    # ---- BPR loss ----
    diff = (jnp.sum(u_u * i_n, axis=-1, keepdims=True)
            - jnp.sum(u_u * i_p, axis=-1, keepdims=True))         # (B, 1)
    softplus = jnp.maximum(diff, 0.0) + jnp.log(1.0 + jnp.exp(-jnp.abs(diff)))
    loss_bpr = jnp.sum(softplus, axis=0, keepdims=True) * inv_b   # (1, 1)

    out_ref[...] = loss_bpr + cl_weight * loss_cl


# --------------------------------------------------------------------------
# Forward wrapper: one pallas_call for the whole CIEGCL forward.
# --------------------------------------------------------------------------

def ciegcl_forward(graph, user_embedding, item_embedding,
                   users, positive_items, negative_items,
                   *, n_layers, temp, cl_weight):
    U, I = graph.shape
    D = user_embedding.shape[1]

    kernel = functools.partial(_ciegcl_fused_kernel, n_layers=n_layers,
                               temp=temp, cl_weight=cl_weight)

    out = pl.pallas_call(
        kernel,
        out_shape=jax.ShapeDtypeStruct((1, 1), jnp.float32),
        grid_spec=pltpu.PrefetchScalarGridSpec(
            num_scalar_prefetch=3,                     # users, pos, neg -> SMEM
            grid=(1,),
            in_specs=[
                pl.BlockSpec((U, I), lambda i, u, p, n: (0, 0)),   # graph
                pl.BlockSpec((U, D), lambda i, u, p, n: (0, 0)),   # user emb
                pl.BlockSpec((I, D), lambda i, u, p, n: (0, 0)),   # item emb
            ],
            out_specs=pl.BlockSpec((1, 1), lambda i, u, p, n: (0, 0)),
        ),
        compiler_params=pltpu.CompilerParams(
            dimension_semantics=("arbitrary",),
        ),
    )(users.astype(jnp.int32),
      positive_items.astype(jnp.int32),
      negative_items.astype(jnp.int32),
      graph.astype(jnp.bfloat16),
      user_embedding.astype(jnp.bfloat16),
      item_embedding.astype(jnp.bfloat16))
    return out[0, 0]


# --------------------------------------------------------------------------
# Pure-JAX f32 reference (sanity check only)
# --------------------------------------------------------------------------

def _reference_forward(graph, user_embedding, item_embedding,
                       users, positive_items, negative_items,
                       *, n_layers, temp, cl_weight):
    def prop(g):
        u_list, i_list = [user_embedding], [item_embedding]
        for l in range(n_layers):
            u_list.append(g @ i_list[l])
            i_list.append(g.T @ u_list[l])
        return sum(u_list) / (n_layers + 1), sum(i_list) / (n_layers + 1)

    user_e, item_e = prop(graph)
    mask = jnp.zeros_like(graph).at[users, positive_items].set(1.0)
    iu_e, ii_e = prop(graph - graph * mask)

    iu_u, ii_n = iu_e[users], ii_e[negative_items]
    u_u, i_p, i_n = user_e[users], item_e[positive_items], item_e[negative_items]

    neg_score = (jnp.mean(jnp.log(jnp.sum(jnp.exp(iu_u @ user_e.T / temp), 1) + 1e-8))
                 + jnp.mean(jnp.log(jnp.sum(jnp.exp(ii_n @ item_e.T / temp), 1) + 1e-8)))
    pos_score = (jnp.mean(jnp.clip(jnp.sum(iu_u * u_u, 1) / temp, -5.0, 5.0))
                 + jnp.mean(jnp.clip(jnp.sum(ii_n * i_n, 1) / temp, -5.0, 5.0)))
    loss_cl = -pos_score + neg_score
    loss_bpr = jnp.mean(jax.nn.softplus(
        jnp.sum(u_u * i_n, 1) - jnp.sum(u_u * i_p, 1)))
    return loss_bpr + cl_weight * loss_cl


# --------------------------------------------------------------------------
# Main
# --------------------------------------------------------------------------

if __name__ == "__main__":
    num_users = 64
    num_items = 128
    embedding_dim = 32
    n_layers = 2
    temp = 0.2
    cl_weight = 0.1
    batch = 8

    key = jax.random.PRNGKey(0)
    k_u, k_i, k_g, k_users, k_pos, k_neg = jax.random.split(key, 6)

    # xavier_uniform init: bound = sqrt(6 / (fan_in + fan_out))
    bu = (6.0 / (num_users + embedding_dim)) ** 0.5
    bi = (6.0 / (num_items + embedding_dim)) ** 0.5
    user_embedding = jax.random.uniform(
        k_u, (num_users, embedding_dim), jnp.float32, -bu, bu)
    item_embedding = jax.random.uniform(
        k_i, (num_items, embedding_dim), jnp.float32, -bi, bi)

    # symmetric-normalized dense bipartite graph D_u^{-1/2} A D_i^{-1/2}
    adj = (jax.random.uniform(k_g, (num_users, num_items)) < 0.1).astype(jnp.float32)
    d_u = jnp.sum(adj, axis=1, keepdims=True)
    d_i = jnp.sum(adj, axis=0, keepdims=True)
    inv_sqrt_u = jnp.where(d_u > 0, 1.0 / jnp.sqrt(d_u), 0.0)
    inv_sqrt_i = jnp.where(d_i > 0, 1.0 / jnp.sqrt(d_i), 0.0)
    graph = adj * inv_sqrt_u * inv_sqrt_i

    users = jax.random.randint(k_users, (batch,), 0, num_users)
    positive_items = jax.random.randint(k_pos, (batch,), 0, num_items)
    negative_items = jax.random.randint(k_neg, (batch,), 0, num_items)

    fwd = jax.jit(functools.partial(
        ciegcl_forward, n_layers=n_layers, temp=temp, cl_weight=cl_weight))
    loss = fwd(graph, user_embedding, item_embedding,
               users, positive_items, negative_items)
    loss = jax.block_until_ready(loss)

    ref = _reference_forward(
        graph, user_embedding, item_embedding,
        users, positive_items, negative_items,
        n_layers=n_layers, temp=temp, cl_weight=cl_weight)
    ref = jax.block_until_ready(ref)

    assert jnp.isfinite(loss), f"non-finite loss: {loss}"
    # bf16 MXU inputs (f32 accumulation) => loosened tolerance vs f32 reference
    assert jnp.allclose(loss, ref, rtol=2e-2, atol=2e-2), (loss, ref)

    print("KERNEL_OK")
</pallas_src>

<mosaic_0001>
module attributes {stable_mosaic.version = 11 : i64} {
  func.func @_ciegcl_fused_kernel(%arg0: i32, %arg1: memref<8xi32, #tpu.memory_space<smem>>, %arg2: memref<8xi32, #tpu.memory_space<smem>>, %arg3: memref<8xi32, #tpu.memory_space<smem>>, %arg4: memref<64x128xbf16, #tpu.memory_space<vmem>>, %arg5: memref<64x32xbf16, #tpu.memory_space<vmem>>, %arg6: memref<128x32xbf16, #tpu.memory_space<vmem>>, %arg7: memref<1x1xf32, #tpu.memory_space<vmem>>) attributes {dimension_semantics = [#tpu.dimension_semantics<arbitrary>], iteration_bounds = array<i64: 1>, scalar_prefetch = 3 : i64, scratch_operands = 0 : i64, tpu.core_type = #tpu.core_type<tc>, window_params = [{pipeline_mode = #tpu.pipeline_mode<synchronous>, transform_indices = @transform_0, window_bounds = array<i64: 64, 128>}, {pipeline_mode = #tpu.pipeline_mode<synchronous>, transform_indices = @transform_1, window_bounds = array<i64: 64, 32>}, {pipeline_mode = #tpu.pipeline_mode<synchronous>, transform_indices = @transform_2, window_bounds = array<i64: 128, 32>}, {pipeline_mode = #tpu.pipeline_mode<synchronous>, transform_indices = @transform_3, window_bounds = array<i64: 1, 1>}]} {
    %c0 = arith.constant 0 : index
    %c0_0 = arith.constant 0 : index
    %0 = vector.load %arg4[%c0, %c0_0] : memref<64x128xbf16, #tpu.memory_space<vmem>>, vector<64x128xbf16>
    %c0_1 = arith.constant 0 : index
    %c0_2 = arith.constant 0 : index
    %1 = vector.load %arg5[%c0_1, %c0_2] : memref<64x32xbf16, #tpu.memory_space<vmem>>, vector<64x32xbf16>
    %c0_3 = arith.constant 0 : index
    %c0_4 = arith.constant 0 : index
    %2 = vector.load %arg6[%c0_3, %c0_4] : memref<128x32xbf16, #tpu.memory_space<vmem>>, vector<128x32xbf16>
    %3 = tpu.transpose %0, [1, 0] : vector<64x128xbf16> -> vector<128x64xbf16>
    %4 = arith.extf %1 : vector<64x32xbf16> to vector<64x32xf32>
    %5 = arith.extf %2 : vector<128x32xbf16> to vector<128x32xf32>
    %cst = arith.constant dense<0.000000e+00> : vector<64x32xf32>
    %6 = tpu.matmul %0, %2, %cst {dimension_numbers = #tpu.dot_dimension_numbers<[1], [0], [0], [1], [0, 0, 1, 1], [], []>} : vector<64x128xbf16>, vector<128x32xbf16>, vector<64x32xf32> -> vector<64x32xf32>
    %cst_5 = arith.constant dense<0.000000e+00> : vector<128x32xf32>
    %7 = tpu.matmul %3, %1, %cst_5 {dimension_numbers = #tpu.dot_dimension_numbers<[1], [0], [0], [1], [0, 0, 1, 1], [], []>} : vector<128x64xbf16>, vector<64x32xbf16>, vector<128x32xf32> -> vector<128x32xf32>
    %8 = arith.addf %4, %6 : vector<64x32xf32>
    %9 = arith.addf %5, %7 : vector<128x32xf32>
    %10 = arith.truncf %6 : vector<64x32xf32> to vector<64x32xbf16>
    %11 = arith.truncf %7 : vector<128x32xf32> to vector<128x32xbf16>
    %cst_6 = arith.constant dense<0.000000e+00> : vector<64x32xf32>
    %12 = tpu.matmul %0, %11, %cst_6 {dimension_numbers = #tpu.dot_dimension_numbers<[1], [0], [0], [1], [0, 0, 1, 1], [], []>} : vector<64x128xbf16>, vector<128x32xbf16>, vector<64x32xf32> -> vector<64x32xf32>
    %cst_7 = arith.constant dense<0.000000e+00> : vector<128x32xf32>
    %13 = tpu.matmul %3, %10, %cst_7 {dimension_numbers = #tpu.dot_dimension_numbers<[1], [0], [0], [1], [0, 0, 1, 1], [], []>} : vector<128x64xbf16>, vector<64x32xbf16>, vector<128x32xf32> -> vector<128x32xf32>
    %14 = arith.addf %8, %12 : vector<64x32xf32>
    %15 = arith.addf %9, %13 : vector<128x32xf32>
    %cst_8 = arith.constant 0.333333343 : f32
    %16 = vector.broadcast %cst_8 : f32 to vector<64x32xf32>
    %17 = arith.mulf %14, %16 : vector<64x32xf32>
    %cst_9 = arith.constant 0.333333343 : f32
    %18 = vector.broadcast %cst_9 : f32 to vector<128x32xf32>
    %19 = arith.mulf %15, %18 : vector<128x32xf32>
    %20 = tpu.iota {dimensions = array<i32: 1>} : vector<1x64xi32>
    %c0_10 = arith.constant 0 : index
    %21 = memref.load %arg1[%c0_10] : memref<8xi32, #tpu.memory_space<smem>>
    %22 = vector.broadcast %21 : i32 to vector<1x64xi32>
    %23 = arith.cmpi eq, %20, %22 : vector<1x64xi32>
    %24 = arith.extui %23 : vector<1x64xi1> to vector<1x64xi32>
    %25 = arith.sitofp %24 : vector<1x64xi32> to vector<1x64xf32>
    %c1 = arith.constant 1 : index
    %26 = memref.load %arg1[%c1] : memref<8xi32, #tpu.memory_space<smem>>
    %27 = vector.broadcast %26 : i32 to vector<1x64xi32>
    %28 = arith.cmpi eq, %20, %27 : vector<1x64xi32>
    %29 = arith.extui %28 : vector<1x64xi1> to vector<1x64xi32>
    %30 = arith.sitofp %29 : vector<1x64xi32> to vector<1x64xf32>
    %c2 = arith.constant 2 : index
    %31 = memref.load %arg1[%c2] : memref<8xi32, #tpu.memory_space<smem>>
    %32 = vector.broadcast %31 : i32 to vector<1x64xi32>
    %33 = arith.cmpi eq, %20, %32 : vector<1x64xi32>
    %34 = arith.extui %33 : vector<1x64xi1> to vector<1x64xi32>
    %35 = arith.sitofp %34 : vector<1x64xi32> to vector<1x64xf32>
    %c3 = arith.constant 3 : index
    %36 = memref.load %arg1[%c3] : memref<8xi32, #tpu.memory_space<smem>>
    %37 = vector.broadcast %36 : i32 to vector<1x64xi32>
    %38 = arith.cmpi eq, %20, %37 : vector<1x64xi32>
    %39 = arith.extui %38 : vector<1x64xi1> to vector<1x64xi32>
    %40 = arith.sitofp %39 : vector<1x64xi32> to vector<1x64xf32>
    %c4 = arith.constant 4 : index
    %41 = memref.load %arg1[%c4] : memref<8xi32, #tpu.memory_space<smem>>
    %42 = vector.broadcast %41 : i32 to vector<1x64xi32>
    %43 = arith.cmpi eq, %20, %42 : vector<1x64xi32>
    %44 = arith.extui %43 : vector<1x64xi1> to vector<1x64xi32>
    %45 = arith.sitofp %44 : vector<1x64xi32> to vector<1x64xf32>
    %c5 = arith.constant 5 : index
    %46 = memref.load %arg1[%c5] : memref<8xi32, #tpu.memory_space<smem>>
    %47 = vector.broadcast %46 : i32 to vector<1x64xi32>
    %48 = arith.cmpi eq, %20, %47 : vector<1x64xi32>
    %49 = arith.extui %48 : vector<1x64xi1> to vector<1x64xi32>
    %50 = arith.sitofp %49 : vector<1x64xi32> to vector<1x64xf32>
    %c6 = arith.constant 6 : index
    %51 = memref.load %arg1[%c6] : memref<8xi32, #tpu.memory_space<smem>>
    %52 = vector.broadcast %51 : i32 to vector<1x64xi32>
    %53 = arith.cmpi eq, %20, %52 : vector<1x64xi32>
    %54 = arith.extui %53 : vector<1x64xi1> to vector<1x64xi32>
    %55 = arith.sitofp %54 : vector<1x64xi32> to vector<1x64xf32>
    %c7 = arith.constant 7 : index
    %56 = memref.load %arg1[%c7] : memref<8xi32, #tpu.memory_space<smem>>
    %57 = vector.broadcast %56 : i32 to vector<1x64xi32>
    %58 = arith.cmpi eq, %20, %57 : vector<1x64xi32>
    %59 = arith.extui %58 : vector<1x64xi1> to vector<1x64xi32>
    %60 = arith.sitofp %59 : vector<1x64xi32> to vector<1x64xf32>
    %61 = tpu.concatenate %25, %30, %35, %40, %45, %50, %55, %60 in 0 : vector<1x64xf32>, vector<1x64xf32>, vector<1x64xf32>, vector<1x64xf32>, vector<1x64xf32>, vector<1x64xf32>, vector<1x64xf32>, vector<1x64xf32> -> vector<8x64xf32>
    %62 = arith.truncf %61 : vector<8x64xf32> to vector<8x64xbf16>
    %63 = tpu.iota {dimensions = array<i32: 1>} : vector<1x128xi32>
    %c0_11 = arith.constant 0 : index
    %64 = memref.load %arg2[%c0_11] : memref<8xi32, #tpu.memory_space<smem>>
    %65 = vector.broadcast %64 : i32 to vector<1x128xi32>
    %66 = arith.cmpi eq, %63, %65 : vector<1x128xi32>
    %67 = arith.extui %66 : vector<1x128xi1> to vector<1x128xi32>
    %68 = arith.sitofp %67 : vector<1x128xi32> to vector<1x128xf32>
    %c1_12 = arith.constant 1 : index
    %69 = memref.load %arg2[%c1_12] : memref<8xi32, #tpu.memory_space<smem>>
    %70 = vector.broadcast %69 : i32 to vector<1x128xi32>
    %71 = arith.cmpi eq, %63, %70 : vector<1x128xi32>
    %72 = arith.extui %71 : vector<1x128xi1> to vector<1x128xi32>
    %73 = arith.sitofp %72 : vector<1x128xi32> to vector<1x128xf32>
    %c2_13 = arith.constant 2 : index
    %74 = memref.load %arg2[%c2_13] : memref<8xi32, #tpu.memory_space<smem>>
    %75 = vector.broadcast %74 : i32 to vector<1x128xi32>
    %76 = arith.cmpi eq, %63, %75 : vector<1x128xi32>
    %77 = arith.extui %76 : vector<1x128xi1> to vector<1x128xi32>
    %78 = arith.sitofp %77 : vector<1x128xi32> to vector<1x128xf32>
    %c3_14 = arith.constant 3 : index
    %79 = memref.load %arg2[%c3_14] : memref<8xi32, #tpu.memory_space<smem>>
    %80 = vector.broadcast %79 : i32 to vector<1x128xi32>
    %81 = arith.cmpi eq, %63, %80 : vector<1x128xi32>
    %82 = arith.extui %81 : vector<1x128xi1> to vector<1x128xi32>
    %83 = arith.sitofp %82 : vector<1x128xi32> to vector<1x128xf32>
    %c4_15 = arith.constant 4 : index
    %84 = memref.load %arg2[%c4_15] : memref<8xi32, #tpu.memory_space<smem>>
    %85 = vector.broadcast %84 : i32 to vector<1x128xi32>
    %86 = arith.cmpi eq, %63, %85 : vector<1x128xi32>
    %87 = arith.extui %86 : vector<1x128xi1> to vector<1x128xi32>
    %88 = arith.sitofp %87 : vector<1x128xi32> to vector<1x128xf32>
    %c5_16 = arith.constant 5 : index
    %89 = memref.load %arg2[%c5_16] : memref<8xi32, #tpu.memory_space<smem>>
    %90 = vector.broadcast %89 : i32 to vector<1x128xi32>
    %91 = arith.cmpi eq, %63, %90 : vector<1x128xi32>
    %92 = arith.extui %91 : vector<1x128xi1> to vector<1x128xi32>
    %93 = arith.sitofp %92 : vector<1x128xi32> to vector<1x128xf32>
    %c6_17 = arith.constant 6 : index
    %94 = memref.load %arg2[%c6_17] : memref<8xi32, #tpu.memory_space<smem>>
    %95 = vector.broadcast %94 : i32 to vector<1x128xi32>
    %96 = arith.cmpi eq, %63, %95 : vector<1x128xi32>
    %97 = arith.extui %96 : vector<1x128xi1> to vector<1x128xi32>
    %98 = arith.sitofp %97 : vector<1x128xi32> to vector<1x128xf32>
    %c7_18 = arith.constant 7 : index
    %99 = memref.load %arg2[%c7_18] : memref<8xi32, #tpu.memory_space<smem>>
    %100 = vector.broadcast %99 : i32 to vector<1x128xi32>
    %101 = arith.cmpi eq, %63, %100 : vector<1x128xi32>
    %102 = arith.extui %101 : vector<1x128xi1> to vector<1x128xi32>
    %103 = arith.sitofp %102 : vector<1x128xi32> to vector<1x128xf32>
    %104 = tpu.concatenate %68, %73, %78, %83, %88, %93, %98, %103 in 0 : vector<1x128xf32>, vector<1x128xf32>, vector<1x128xf32>, vector<1x128xf32>, vector<1x128xf32>, vector<1x128xf32>, vector<1x128xf32>, vector<1x128xf32> -> vector<8x128xf32>
    %105 = arith.truncf %104 : vector<8x128xf32> to vector<8x128xbf16>
    %106 = tpu.iota {dimensions = array<i32: 1>} : vector<1x128xi32>
    %c0_19 = arith.constant 0 : index
    %107 = memref.load %arg3[%c0_19] : memref<8xi32, #tpu.memory_space<smem>>
    %108 = vector.broadcast %107 : i32 to vector<1x128xi32>
    %109 = arith.cmpi eq, %106, %108 : vector<1x128xi32>
    %110 = arith.extui %109 : vector<1x128xi1> to vector<1x128xi32>
    %111 = arith.sitofp %110 : vector<1x128xi32> to vector<1x128xf32>
    %c1_20 = arith.constant 1 : index
    %112 = memref.load %arg3[%c1_20] : memref<8xi32, #tpu.memory_space<smem>>
    %113 = vector.broadcast %112 : i32 to vector<1x128xi32>
    %114 = arith.cmpi eq, %106, %113 : vector<1x128xi32>
    %115 = arith.extui %114 : vector<1x128xi1> to vector<1x128xi32>
    %116 = arith.sitofp %115 : vector<1x128xi32> to vector<1x128xf32>
    %c2_21 = arith.constant 2 : index
    %117 = memref.load %arg3[%c2_21] : memref<8xi32, #tpu.memory_space<smem>>
    %118 = vector.broadcast %117 : i32 to vector<1x128xi32>
    %119 = arith.cmpi eq, %106, %118 : vector<1x128xi32>
    %120 = arith.extui %119 : vector<1x128xi1> to vector<1x128xi32>
    %121 = arith.sitofp %120 : vector<1x128xi32> to vector<1x128xf32>
    %c3_22 = arith.constant 3 : index
    %122 = memref.load %arg3[%c3_22] : memref<8xi32, #tpu.memory_space<smem>>
    %123 = vector.broadcast %122 : i32 to vector<1x128xi32>
    %124 = arith.cmpi eq, %106, %123 : vector<1x128xi32>
    %125 = arith.extui %124 : vector<1x128xi1> to vector<1x128xi32>
    %126 = arith.sitofp %125 : vector<1x128xi32> to vector<1x128xf32>
    %c4_23 = arith.constant 4 : index
    %127 = memref.load %arg3[%c4_23] : memref<8xi32, #tpu.memory_space<smem>>
    %128 = vector.broadcast %127 : i32 to vector<1x128xi32>
    %129 = arith.cmpi eq, %106, %128 : vector<1x128xi32>
    %130 = arith.extui %129 : vector<1x128xi1> to vector<1x128xi32>
    %131 = arith.sitofp %130 : vector<1x128xi32> to vector<1x128xf32>
    %c5_24 = arith.constant 5 : index
    %132 = memref.load %arg3[%c5_24] : memref<8xi32, #tpu.memory_space<smem>>
    %133 = vector.broadcast %132 : i32 to vector<1x128xi32>
    %134 = arith.cmpi eq, %106, %133 : vector<1x128xi32>
    %135 = arith.extui %134 : vector<1x128xi1> to vector<1x128xi32>
    %136 = arith.sitofp %135 : vector<1x128xi32> to vector<1x128xf32>
    %c6_25 = arith.constant 6 : index
    %137 = memref.load %arg3[%c6_25] : memref<8xi32, #tpu.memory_space<smem>>
    %138 = vector.broadcast %137 : i32 to vector<1x128xi32>
    %139 = arith.cmpi eq, %106, %138 : vector<1x128xi32>
    %140 = arith.extui %139 : vector<1x128xi1> to vector<1x128xi32>
    %141 = arith.sitofp %140 : vector<1x128xi32> to vector<1x128xf32>
    %c7_26 = arith.constant 7 : index
    %142 = memref.load %arg3[%c7_26] : memref<8xi32, #tpu.memory_space<smem>>
    %143 = vector.broadcast %142 : i32 to vector<1x128xi32>
    %144 = arith.cmpi eq, %106, %143 : vector<1x128xi32>
    %145 = arith.extui %144 : vector<1x128xi1> to vector<1x128xi32>
    %146 = arith.sitofp %145 : vector<1x128xi32> to vector<1x128xf32>
    %147 = tpu.concatenate %111, %116, %121, %126, %131, %136, %141, %146 in 0 : vector<1x128xf32>, vector<1x128xf32>, vector<1x128xf32>, vector<1x128xf32>, vector<1x128xf32>, vector<1x128xf32>, vector<1x128xf32>, vector<1x128xf32> -> vector<8x128xf32>
    %148 = arith.truncf %147 : vector<8x128xf32> to vector<8x128xbf16>
    %cst_27 = arith.constant dense<0.000000e+00> : vector<64x128xf32>
    %149 = tpu.matmul %62, %105, %cst_27 {dimension_numbers = #tpu.dot_dimension_numbers<[0], [0], [1], [1], [0, 1, 1, 1], [], []>} : vector<8x64xbf16>, vector<8x128xbf16>, vector<64x128xf32> -> vector<64x128xf32>
    %cst_28 = arith.constant 1.000000e+00 : f32
    %150 = vector.broadcast %cst_28 : f32 to vector<64x128xf32>
    %151 = arith.minimumf %149, %150 : vector<64x128xf32>
    %152 = arith.truncf %151 : vector<64x128xf32> to vector<64x128xbf16>
    %153 = arith.mulf %0, %152 : vector<64x128xbf16>
    %154 = arith.subf %0, %153 : vector<64x128xbf16>
    %155 = tpu.transpose %154, [1, 0] : vector<64x128xbf16> -> vector<128x64xbf16>
    %156 = arith.extf %1 : vector<64x32xbf16> to vector<64x32xf32>
    %157 = arith.extf %2 : vector<128x32xbf16> to vector<128x32xf32>
    %cst_29 = arith.constant dense<0.000000e+00> : vector<64x32xf32>
    %158 = tpu.matmul %154, %2, %cst_29 {dimension_numbers = #tpu.dot_dimension_numbers<[1], [0], [0], [1], [0, 0, 1, 1], [], []>} : vector<64x128xbf16>, vector<128x32xbf16>, vector<64x32xf32> -> vector<64x32xf32>
    %cst_30 = arith.constant dense<0.000000e+00> : vector<128x32xf32>
    %159 = tpu.matmul %155, %1, %cst_30 {dimension_numbers = #tpu.dot_dimension_numbers<[1], [0], [0], [1], [0, 0, 1, 1], [], []>} : vector<128x64xbf16>, vector<64x32xbf16>, vector<128x32xf32> -> vector<128x32xf32>
    %160 = arith.addf %156, %158 : vector<64x32xf32>
    %161 = arith.addf %157, %159 : vector<128x32xf32>
    %162 = arith.truncf %158 : vector<64x32xf32> to vector<64x32xbf16>
    %163 = arith.truncf %159 : vector<128x32xf32> to vector<128x32xbf16>
    %cst_31 = arith.constant dense<0.000000e+00> : vector<64x32xf32>
    %164 = tpu.matmul %154, %163, %cst_31 {dimension_numbers = #tpu.dot_dimension_numbers<[1], [0], [0], [1], [0, 0, 1, 1], [], []>} : vector<64x128xbf16>, vector<128x32xbf16>, vector<64x32xf32> -> vector<64x32xf32>
    %cst_32 = arith.constant dense<0.000000e+00> : vector<128x32xf32>
    %165 = tpu.matmul %155, %162, %cst_32 {dimension_numbers = #tpu.dot_dimension_numbers<[1], [0], [0], [1], [0, 0, 1, 1], [], []>} : vector<128x64xbf16>, vector<64x32xbf16>, vector<128x32xf32> -> vector<128x32xf32>
    %166 = arith.addf %160, %164 : vector<64x32xf32>
    %167 = arith.addf %161, %165 : vector<128x32xf32>
    %cst_33 = arith.constant 0.333333343 : f32
    %168 = vector.broadcast %cst_33 : f32 to vector<64x32xf32>
    %169 = arith.mulf %166, %168 : vector<64x32xf32>
    %cst_34 = arith.constant 0.333333343 : f32
    %170 = vector.broadcast %cst_34 : f32 to vector<128x32xf32>
    %171 = arith.mulf %167, %170 : vector<128x32xf32>
    %172 = arith.truncf %17 : vector<64x32xf32> to vector<64x32xbf16>
    %173 = arith.truncf %19 : vector<128x32xf32> to vector<128x32xbf16>
    %174 = arith.truncf %169 : vector<64x32xf32> to vector<64x32xbf16>
    %175 = arith.truncf %171 : vector<128x32xf32> to vector<128x32xbf16>
    %176 = tpu.concatenate %172, %174 in 1 : vector<64x32xbf16>, vector<64x32xbf16> -> vector<64x64xbf16>
    %cst_35 = arith.constant dense<0.000000e+00> : vector<8x64xf32>
    %177 = tpu.matmul %62, %176, %cst_35 {dimension_numbers = #tpu.dot_dimension_numbers<[1], [0], [0], [1], [0, 0, 1, 1], [], []>} : vector<8x64xbf16>, vector<64x64xbf16>, vector<8x64xf32> -> vector<8x64xf32>
    %178 = vector.extract_strided_slice %177 {offsets = [0, 0], sizes = [8, 32], strides = [1, 1]} : vector<8x64xf32> to vector<8x32xf32>
    %179 = vector.extract_strided_slice %177 {offsets = [0, 32], sizes = [8, 32], strides = [1, 1]} : vector<8x64xf32> to vector<8x32xf32>
    %180 = tpu.concatenate %105, %148 in 0 : vector<8x128xbf16>, vector<8x128xbf16> -> vector<16x128xbf16>
    %181 = tpu.concatenate %173, %175 in 1 : vector<128x32xbf16>, vector<128x32xbf16> -> vector<128x64xbf16>
    %cst_36 = arith.constant dense<0.000000e+00> : vector<16x64xf32>
    %182 = tpu.matmul %180, %181, %cst_36 {dimension_numbers = #tpu.dot_dimension_numbers<[1], [0], [0], [1], [0, 0, 1, 1], [], []>} : vector<16x128xbf16>, vector<128x64xbf16>, vector<16x64xf32> -> vector<16x64xf32>
    %183 = vector.extract_strided_slice %182 {offsets = [0, 0], sizes = [8, 32], strides = [1, 1]} : vector<16x64xf32> to vector<8x32xf32>
    %184 = vector.extract_strided_slice %182 {offsets = [8, 0], sizes = [8, 32], strides = [1, 1]} : vector<16x64xf32> to vector<8x32xf32>
    %185 = vector.extract_strided_slice %182 {offsets = [8, 32], sizes = [8, 32], strides = [1, 1]} : vector<16x64xf32> to vector<8x32xf32>
    %186 = tpu.concatenate %179, %185 in 0 : vector<8x32xf32>, vector<8x32xf32> -> vector<16x32xf32>
    %187 = arith.truncf %186 : vector<16x32xf32> to vector<16x32xbf16>
    %188 = tpu.concatenate %172, %173 in 0 : vector<64x32xbf16>, vector<128x32xbf16> -> vector<192x32xbf16>
    %cst_37 = arith.constant dense<0.000000e+00> : vector<16x192xf32>
    %189 = tpu.matmul %187, %188, %cst_37 {dimension_numbers = #tpu.dot_dimension_numbers<[1], [1], [0], [0], [0, 0, 1, 0], [], []>} : vector<16x32xbf16>, vector<192x32xbf16>, vector<16x192xf32> -> vector<16x192xf32>
    %cst_38 = arith.constant 5.000000e+00 : f32
    %190 = vector.broadcast %cst_38 : f32 to vector<16x192xf32>
    %191 = arith.mulf %189, %190 : vector<16x192xf32>
    %192 = tpu.iota {dimensions = array<i32: 0>} : vector<16x192xi32>
    %193 = tpu.iota {dimensions = array<i32: 1>} : vector<16x192xi32>
    %c8_i32 = arith.constant 8 : i32
    %194 = vector.broadcast %c8_i32 : i32 to vector<16x192xi32>
    %195 = arith.cmpi slt, %192, %194 : vector<16x192xi32>
    %c64_i32 = arith.constant 64 : i32
    %196 = vector.broadcast %c64_i32 : i32 to vector<16x192xi32>
    %197 = arith.cmpi slt, %193, %196 : vector<16x192xi32>
    %198 = arith.andi %195, %197 : vector<16x192xi1>
    %cst_39 = arith.constant dense<true> : vector<16x192xi1>
    %199 = arith.xori %195, %cst_39 : vector<16x192xi1>
    %cst_40 = arith.constant dense<true> : vector<16x192xi1>
    %200 = arith.xori %197, %cst_40 : vector<16x192xi1>
    %201 = arith.andi %199, %200 : vector<16x192xi1>
    %202 = arith.ori %198, %201 : vector<16x192xi1>
    %cst_41 = arith.constant -1.000000e+30 : f32
    %203 = vector.broadcast %cst_41 : f32 to vector<16x192xf32>
    %204 = arith.select %202, %191, %203 : vector<16x192xi1>, vector<16x192xf32>
    %cst_42 = arith.constant dense<0xFF800000> : vector<16xf32>
    %205 = vector.multi_reduction <maximumf>, %204, %cst_42 [1] : vector<16x192xf32> to vector<16xf32>
    %206 = vector.shape_cast %205 : vector<16xf32> to vector<16x1xf32>
    %cst_43 = arith.constant 0.000000e+00 : f32
    %207 = vector.broadcast %cst_43 : f32 to vector<16x1xf32>
    %208 = arith.maximumf %206, %207 : vector<16x1xf32>
    %209 = vector.broadcast %208 : vector<16x1xf32> to vector<16x192xf32>
    %210 = arith.subf %204, %209 : vector<16x192xf32>
    %211 = math.exp %210 : vector<16x192xf32>
    %cst_44 = arith.constant dense<0.000000e+00> : vector<16xf32>
    %212 = vector.multi_reduction <add>, %211, %cst_44 [1] : vector<16x192xf32> to vector<16xf32>
    %213 = vector.shape_cast %212 : vector<16xf32> to vector<16x1xf32>
    %cst_45 = arith.constant 0.000000e+00 : f32
    %214 = vector.broadcast %cst_45 : f32 to vector<16x1xf32>
    %215 = arith.subf %214, %208 : vector<16x1xf32>
    %216 = math.exp %215 : vector<16x1xf32>
    %cst_46 = arith.constant 9.99999993E-9 : f32
    %217 = vector.broadcast %cst_46 : f32 to vector<16x1xf32>
    %218 = arith.mulf %217, %216 : vector<16x1xf32>
    %219 = arith.addf %213, %218 : vector<16x1xf32>
    %220 = math.log %219 : vector<16x1xf32>
    %221 = arith.addf %208, %220 : vector<16x1xf32>
    %cst_47 = arith.constant dense<0.000000e+00> : vector<1xf32>
    %222 = vector.multi_reduction <add>, %221, %cst_47 [0] : vector<16x1xf32> to vector<1xf32>
    %223 = vector.shape_cast %222 : vector<1xf32> to vector<1x1xf32>
    %cst_48 = arith.constant 1.250000e-01 : f32
    %224 = vector.broadcast %cst_48 : f32 to vector<1x1xf32>
    %225 = arith.mulf %223, %224 : vector<1x1xf32>
    %226 = arith.mulf %179, %178 : vector<8x32xf32>
    %227 = arith.mulf %185, %184 : vector<8x32xf32>
    %228 = tpu.concatenate %226, %227 in 0 : vector<8x32xf32>, vector<8x32xf32> -> vector<16x32xf32>
    %cst_49 = arith.constant dense<0.000000e+00> : vector<16xf32>
    %229 = vector.multi_reduction <add>, %228, %cst_49 [1] : vector<16x32xf32> to vector<16xf32>
    %230 = vector.shape_cast %229 : vector<16xf32> to vector<16x1xf32>
    %cst_50 = arith.constant 5.000000e+00 : f32
    %231 = vector.broadcast %cst_50 : f32 to vector<16x1xf32>
    %232 = arith.mulf %230, %231 : vector<16x1xf32>
    %cst_51 = arith.constant -5.000000e+00 : f32
    %cst_52 = arith.constant 5.000000e+00 : f32
    %233 = vector.broadcast %cst_51 : f32 to vector<16x1xf32>
    %234 = arith.maximumf %233, %232 : vector<16x1xf32>
    %235 = vector.broadcast %cst_52 : f32 to vector<16x1xf32>
    %236 = arith.minimumf %235, %234 : vector<16x1xf32>
    %cst_53 = arith.constant dense<0.000000e+00> : vector<1xf32>
    %237 = vector.multi_reduction <add>, %236, %cst_53 [0] : vector<16x1xf32> to vector<1xf32>
    %238 = vector.shape_cast %237 : vector<1xf32> to vector<1x1xf32>
    %cst_54 = arith.constant 1.250000e-01 : f32
    %239 = vector.broadcast %cst_54 : f32 to vector<1x1xf32>
    %240 = arith.mulf %238, %239 : vector<1x1xf32>
    %241 = arith.subf %225, %240 : vector<1x1xf32>
    %242 = arith.mulf %178, %184 : vector<8x32xf32>
    %cst_55 = arith.constant dense<0.000000e+00> : vector<8xf32>
    %243 = vector.multi_reduction <add>, %242, %cst_55 [1] : vector<8x32xf32> to vector<8xf32>
    %244 = vector.shape_cast %243 : vector<8xf32> to vector<8x1xf32>
    %245 = arith.mulf %178, %183 : vector<8x32xf32>
    %cst_56 = arith.constant dense<0.000000e+00> : vector<8xf32>
    %246 = vector.multi_reduction <add>, %245, %cst_56 [1] : vector<8x32xf32> to vector<8xf32>
    %247 = vector.shape_cast %246 : vector<8xf32> to vector<8x1xf32>
    %248 = arith.subf %244, %247 : vector<8x1xf32>
    %cst_57 = arith.constant 0.000000e+00 : f32
    %249 = vector.broadcast %cst_57 : f32 to vector<8x1xf32>
    %250 = arith.maximumf %248, %249 : vector<8x1xf32>
    %251 = math.absf %248 : vector<8x1xf32>
    %cst_58 = arith.constant 0.000000e+00 : f32
    %252 = vector.broadcast %cst_58 : f32 to vector<8x1xf32>
    %253 = arith.subf %252, %251 : vector<8x1xf32>
    %254 = math.exp %253 : vector<8x1xf32>
    %cst_59 = arith.constant 1.000000e+00 : f32
    %255 = vector.broadcast %cst_59 : f32 to vector<8x1xf32>
    %256 = arith.addf %255, %254 : vector<8x1xf32>
    %257 = math.log %256 : vector<8x1xf32>
    %258 = arith.addf %250, %257 : vector<8x1xf32>
    %cst_60 = arith.constant dense<0.000000e+00> : vector<1xf32>
    %259 = vector.multi_reduction <add>, %258, %cst_60 [0] : vector<8x1xf32> to vector<1xf32>
    %260 = vector.shape_cast %259 : vector<1xf32> to vector<1x1xf32>
    %cst_61 = arith.constant 1.250000e-01 : f32
    %261 = vector.broadcast %cst_61 : f32 to vector<1x1xf32>
    %262 = arith.mulf %260, %261 : vector<1x1xf32>
    %cst_62 = arith.constant 1.000000e-01 : f32
    %263 = vector.broadcast %cst_62 : f32 to vector<1x1xf32>
    %264 = arith.mulf %263, %241 : vector<1x1xf32>
    %265 = arith.addf %262, %264 : vector<1x1xf32>
    %c0_63 = arith.constant 0 : index
    %c0_64 = arith.constant 0 : index
    %266 = vector.load %arg7[%c0_63, %c0_64] : memref<1x1xf32, #tpu.memory_space<vmem>>, vector<1x1xf32>
    tpu.vector_store %arg7[%c0_63, %c0_64], %265 {strides = array<i32>} : memref<1x1xf32, #tpu.memory_space<vmem>>, vector<1x1xf32>,
    return
  }
  func.func @transform_0(%arg0: i32, %arg1: memref<8xi32, #tpu.memory_space<smem>>, %arg2: memref<8xi32, #tpu.memory_space<smem>>, %arg3: memref<8xi32, #tpu.memory_space<smem>>) -> (i32, i32) {
    %c0_i32 = arith.constant 0 : i32
    %c0_i32_0 = arith.constant 0 : i32
    %c0_i32_1 = arith.constant 0 : i32
    return %c0_i32, %c0_i32_0 : i32, i32
  }
  func.func @transform_1(%arg0: i32, %arg1: memref<8xi32, #tpu.memory_space<smem>>, %arg2: memref<8xi32, #tpu.memory_space<smem>>, %arg3: memref<8xi32, #tpu.memory_space<smem>>) -> (i32, i32) {
    %c0_i32 = arith.constant 0 : i32
    %c0_i32_0 = arith.constant 0 : i32
    %c0_i32_1 = arith.constant 0 : i32
    return %c0_i32, %c0_i32_0 : i32, i32
  }
  func.func @transform_2(%arg0: i32, %arg1: memref<8xi32, #tpu.memory_space<smem>>, %arg2: memref<8xi32, #tpu.memory_space<smem>>, %arg3: memref<8xi32, #tpu.memory_space<smem>>) -> (i32, i32) {
    %c0_i32 = arith.constant 0 : i32
    %c0_i32_0 = arith.constant 0 : i32
    %c0_i32_1 = arith.constant 0 : i32
    return %c0_i32, %c0_i32_0 : i32, i32
  }
  func.func @transform_3(%arg0: i32, %arg1: memref<8xi32, #tpu.memory_space<smem>>, %arg2: memref<8xi32, #tpu.memory_space<smem>>, %arg3: memref<8xi32, #tpu.memory_space<smem>>) -> (i32, i32) {
    %c0_i32 = arith.constant 0 : i32
    %c0_i32_0 = arith.constant 0 : i32
    %c0_i32_1 = arith.constant 0 : i32
    return %c0_i32, %c0_i32_0 : i32, i32
  }
}

</mosaic_0001>

<bundles_post_ra>
// kernel: ciegcl_forward.1
= control target key start
LH: loop header
LB: loop body
LE: loop exit
PB: predicated region body
PF: predicated region fallthrough
CT: control target
= control target key end

     0   :  { %s3296_s0 = inlined_call_operand.vmem [shape: s32[8], index: 0, kind: input, shape index: {}]   ;;  %s3297_s3 = inlined_call_operand.vmem [shape: bf16[64,128], index: 3, kind: input, shape index: {}]   ;;  %s3298_s4 = inlined_call_operand.vmem [shape: bf16[64,32], index: 4, kind: input, shape index: {}]   ;;  %s3299_s5 = inlined_call_operand.vmem [shape: bf16[128,32], index: 5, kind: input, shape index: {}]   ;;  %s3300_s6 = inlined_call_operand.hbm [shape: f32[1,1], index: 6, kind: output, shape index: {}]   ;;  %s3301_s1 = inlined_call_operand.vmem [shape: s32[8], index: 1, kind: input, shape index: {}]   ;;  %s3302_s2 = inlined_call_operand.vmem [shape: s32[8], index: 2, kind: input, shape index: {}]  }
   0x1   :  { %s11_s23 = sshll.u32 %s3296_s0, 4  ;;  %s15_s26 = sshll.u32 %s3301_s1, 4  ;;  %s12_s23 = int_to_ptr.vmem [resolvable:$true] %s11_s23  ;;  %s16_s26 = int_to_ptr.vmem [resolvable:$true] %s15_s26 }
   0x2   :  { %s2382_s27 = scalar_lea.vmem %s12_s23, 16  ;;  %p2387_p1 = scmp.lt.s32.totalorder %s12_s23, %s12_s23 }
   0x3   :  { %p2383_p0 = scmp.ne.s32.totalorder %s12_s23, %s2382_s27  ;;  %p2388_p2 = scmp.lt.s32.totalorder %s2382_s27, %s2382_s27 }
   0x5   :  { %p2389_p3 = por %p2388_p2, %p2387_p1 }
   0x7   :  { %p2390_p4 = pnand %p2389_p3, %p2383_p0 }
   0x9   :  { %2393 = shalt.err (!%p2390_p4)  }
   0xa   :  { %s2444_s28 = smov [#allocation3]   ;;  %s2394_s29 = scalar_lea.vmem %s16_s26, 16 }
   0xb   :  { %14 = dma.vmem_to_smem %s12_s23, 16, %s2444_s28, [#allocation2] }
   0xc   :  { %p2395_p5 = scmp.ne.s32.totalorder %s16_s26, %s2394_s29  ;;  %p2399_p6 = scmp.lt.s32.totalorder %s16_s26, %s16_s26 }
   0xd   :  { %p2400_p7 = scmp.lt.s32.totalorder %s2394_s29, %s2394_s29 }
   0xf   :  { %p2401_p8 = por %p2400_p7, %p2399_p6 }
  0x11   :  { %p2402_p9 = pnand %p2401_p8, %p2395_p5 }
  0x13   :  { %2405 = shalt.err (!%p2402_p9)  }
  0x14   :  { %s2445_s0 = smov [#allocation4]   ;;  %s19_s7 = sshll.u32 %s3302_s2, 4  ;;  %s20_s7 = int_to_ptr.vmem [resolvable:$true] %s19_s7 }
  0x15   :  { %18 = dma.vmem_to_smem %s16_s26, 16, %s2445_s0, [#allocation2] }
  0x16   :  { %s2406_s8 = scalar_lea.vmem %s20_s7, 16  ;;  %p2411_p11 = scmp.lt.s32.totalorder %s20_s7, %s20_s7 }
  0x17   :  { %p2407_p10 = scmp.ne.s32.totalorder %s20_s7, %s2406_s8  ;;  %p2412_p12 = scmp.lt.s32.totalorder %s2406_s8, %s2406_s8 }
  0x19   :  { %p2413_p13 = por %p2412_p12, %p2411_p11 }
  0x1b   :  { %p2414_p0 = pnand %p2413_p13, %p2407_p10 }
  0x1d   :  { %2417 = shalt.err (!%p2414_p0)  }
  0x1e   :  { %s2446_s9 = smov [#allocation5]  }
  0x1f   :  { %22 = dma.vmem_to_smem %s20_s7, 16, %s2446_s9, [#allocation2] }
  0x20   :  { %2440 = dma.done.wait [#allocation2], 48 }
  0x21   :  { %2441 = vsyncadd [#allocation2], 4294967248 }
  0x22   :  { %24 = sfence }
  0x23   :  { %v2502_v0 = vld [vmem:[%s3299_s5] sm:$0xff]   ;;  %v2521_v4 = vld [vmem:[%s3299_s5 + $0x8] sm:$0xff]   ;;  %v2536_v7 = vld [vmem:[%s3299_s5 + $0x10] sm:$0xff]  }
  0x24   :  { %v2507_v1 = vld [vmem:[%s3297_s3] sm:$0xf]  ;;  %v2512_v2 = vld [vmem:[%s3297_s3 + $0x4] sm:$0xf]  ;;  %v2526_v5 = vld [vmem:[%s3297_s3 + $0x8] sm:$0xf]  ;;  %2088 = vmatprep.subr.bf16.mxu1 %v2502_v0 }
  0x25   :  { %v2516_v3 = vcombine.low %v2507_v1, %v2512_v2  ;;  %v2531_v6 = vld [vmem:[%s3297_s3 + $0xc] sm:$0xf]  ;;  %2089 = vmatpush3.bf16.msra.mxu1 %v2502_v0  ;;  %v2548_v9 = vld [vmem:[%s3297_s3 + $0x10] sm:$0xf]  ;;  %v2553_v10 = vld [vmem:[%s3297_s3 + $0x14] sm:$0xf] }
  0x26   :  { %v2542_v8 = vcombine.low %v2526_v5, %v2531_v6  ;;  %2090 = vmatprep.subr.bf16.mxu1 %v2521_v4  ;;  %v2560_v11 = vld [vmem:[%s3299_s5 + $0x18] sm:$0xff]  }
  0x27   :  { %89 = vxpose.xlu0.c.b16.start [1/4] (short) %v2516_v3, 128  ;;  %2104 = vmatprep.mubr.bf16.mxu1 %v2516_v3 }
  0x28   :  { %25 = vsyncpa [#allocation7], 0  ;;  %v2565_v12 = vcombine.low %v2548_v9, %v2553_v10  ;;  %v2571_v13 = vld [vmem:[%s3297_s3 + $0x18] sm:$0xf]  ;;  %v2576_v14 = vld [vmem:[%s3297_s3 + $0x1c] sm:$0xf]  ;;  %v634_v30 = vlaneseq }
  0x29   :  { %2091 = vmatpush3.bf16.msra.mxu1 %v2521_v4  ;;  %v2582_v15 = vld [vmem:[%s3299_s5 + $0x20] sm:$0xff]   ;;  %v2587_v16 = vcombine.low %v2571_v13, %v2576_v14  ;;  %v2594_v17 = vld [vmem:[%s3299_s5 + $0x28] sm:$0xff]   ;;  %v2602_v18 = vld [vmem:[%s3299_s5 + $0x30] sm:$0xff]   ;;  %vm266_vm0 = vcmask 523264   ;;  %s1885_s20 = sld [smem:[#allocation3 + $0x1]]  ;;  %s1887_s21 = sld [smem:[#allocation3 + $0x2]] }
  0x2a   :  { %2092 = vmatprep.subr.bf16.mxu1 %v2536_v7  ;;  %v2609_v19 = vld [vmem:[%s3299_s5 + $0x38] sm:$0xff]   ;;  %v2616_v20 = vld [vmem:[%s3298_s4] sm:$0xff]   ;;  %v2623_v21 = vld [vmem:[%s3298_s4 + $0x8] sm:$0xff]   ;;  %s1889_s22 = sld [smem:[#allocation3 + $0x3]]  ;;  %s1891_s23 = sld [smem:[#allocation3 + $0x4]]  ;;  %v2669_v31 = vand.u32 127, %v634_v30 }
  0x2b   :  { %90 = vxpose.xlu0.c.b16.cont [2/4] (short) %v2542_v8, 128  ;;  %v2630_v22 = vld [vmem:[%s3298_s4 + $0x10] sm:$0xff]   ;;  %v2639_v23 = vld [vmem:[%s3298_s4 + $0x18] sm:$0xff]   ;;  %s636_s4 = sld [smem:[#allocation3]]  ;;  %s1893_s24 = sld [smem:[#allocation3 + $0x5]]  ;;  %v3305_v35 = vmov 0.0   ;;  %vm676_vm5 = vcmask 1040384  }
  0x2c   :  { %3336 = vst [vmem:[#allocation10_spill] sm:$0xff] %v2669_v31  ;;  %s1895_s25 = sld [smem:[#allocation3 + $0x6]]  ;;  %s1897_s26 = sld [smem:[#allocation3 + $0x7]]  ;;  %vm678_vm9 = vcmask 1041408   ;;  %vm680_vm11 = vcmask 1042432   ;;  %vm682_vm12 = vcmask 1043456  }
  0x2d   :  { %2093 = vmatpush3.bf16.msra.mxu1 %v2536_v7  ;;  %vm684_vm13 = vcmask 1044480   ;;  %vm686_vm14 = vcmask 1045504   ;;  %vm688_vm15 = vcmask 1046528   ;;  %s691_s27 = sld [smem:[#allocation4]]  ;;  %s1900_s28 = sld [smem:[#allocation4 + $0x1]] }
  0x2e   :  { %2094 = vmatprep.subr.bf16.mxu1 %v2560_v11  ;;  %s1902_s29 = sld [smem:[#allocation4 + $0x2]]  ;;  %s1904_s0 = sld [smem:[#allocation4 + $0x3]] }
  0x2f   :  { %91 = vxpose.xlu0.c.b16.cont [3/4] (short) %v2565_v12, 128  ;;  %v642_v33 = vstv %s1885_s20  ;;  %v647_v38 = vstv %s1887_s21  ;;  %s1906_s1 = sld [smem:[#allocation4 + $0x4]]  ;;  %s1908_s30 = sld [smem:[#allocation4 + $0x5]] }
  0x30   :  { %vm643_vm2 = vcmp.eq.s32.totalorder %v2669_v31, %v642_v33  ;;  %v652_v39 = vstv %s1889_s22  ;;  %vm648_vm3 = vcmp.eq.s32.totalorder %v2669_v31, %v647_v38  ;;  %v657_v40 = vstv %s1891_s23  ;;  %s1910_s7 = sld [smem:[#allocation4 + $0x6]]  ;;  %s1912_s8 = sld [smem:[#allocation4 + $0x7]] }
  0x31   :  { %2095 = vmatpush3.bf16.msra.mxu1 %v2560_v11  ;;  %v637_v32 = vstv %s636_s4  ;;  %v1886_v37 = vsel %vm643_vm2, 1.0, %v3305_v35  ;;  %vm653_vm4 = vcmp.eq.s32.totalorder %v2669_v31, %v652_v39  ;;  %v1888_v41 = vsel %vm648_vm3, 1.0, %v3305_v35  ;;  %s2705_s9 = sld [smem:[#allocation5]]  ;;  %s2707_s3 = sld [smem:[#allocation5 + $0x1]] }
  0x32   :  { %2096 = vmatprep.subr.bf16.mxu1 %v2582_v15  ;;  %vm638_vm1 = vcmp.eq.s32.totalorder %v2669_v31, %v637_v32  ;;  %v1890_v42 = vsel %vm653_vm4, 1.0, %v3305_v35  ;;  %vm658_vm6 = vcmp.eq.s32.totalorder %v2669_v31, %v657_v40  ;;  %v662_v43 = vstv %s1893_s24  ;;  %s2709_s10 = sld [smem:[#allocation5 + $0x2]]  ;;  %s2714_s11 = sld [smem:[#allocation5 + $0x3]] }
  0x33   :  { %92 = vxpose.xlu0.c.b16.end [4/4] (short) %v2587_v16, 128  ;;  %v1884_v36 = vsel %vm638_vm1, 1.0, %v3305_v35  ;;  %v1892_v45 = vsel %vm658_vm6, 1.0, %v3305_v35  ;;  %vm663_vm7 = vcmp.eq.s32.totalorder %v2669_v31, %v662_v43  ;;  %v667_v46 = vstv %s1895_s25  ;;  %s2719_s12 = sld [smem:[#allocation5 + $0x4]]  ;;  %s2721_s2 = sld [smem:[#allocation5 + $0x5]] }
  0x34   :  { %v677_v47 = vsel %vm676_vm5, %v1884_v36, %v1886_v37  ;;  %v1894_v48 = vsel %vm663_vm7, 1.0, %v3305_v35  ;;  %vm668_vm8 = vcmp.eq.s32.totalorder %v2669_v31, %v667_v46  ;;  %v672_v49 = vstv %s1897_s26  ;;  %s2727_s13 = sld [smem:[#allocation5 + $0x6]]  ;;  %s2733_s14 = sld [smem:[#allocation5 + $0x7]] }
  0x35   :  { %2097 = vmatpush3.bf16.msra.mxu1 %v2582_v15  ;;  %v1896_v50 = vsel %vm668_vm8, 1.0, %v3305_v35  ;;  %vm673_vm10 = vcmp.eq.s32.totalorder %v2669_v31, %v672_v49  ;;  %v679_v51 = vsel %vm678_vm9, %v677_v47, %v1888_v41  ;;  %v692_v59 = vstv %s691_s27  ;;  %s2448_s15 = smov 32   ;;  %s2451_s16 = smov 96  }
  0x36   :  { %2098 = vmatprep.subr.bf16.mxu1 %v2594_v17  ;;  %v1898_v52 = vsel %vm673_vm10, 1.0, %v3305_v35  ;;  %v681_v53 = vsel %vm680_vm11, %v679_v51, %v1890_v42  ;;  %v697_v60 = vstv %s1900_s28  ;;  %vm693_vm1 = vcmp.eq.s32.totalorder %v2669_v31, %v692_v59  ;;  %s2454_s5 = smov [#allocation6]  }
  0x37   :  { %v683_v54 = vsel %vm682_vm12, %v681_v53, %v1892_v45  ;;  %vm698_vm2 = vcmp.eq.s32.totalorder %v2669_v31, %v697_v60  ;;  %v702_v61 = vstv %s1902_s29  ;;  %v707_v62 = vstv %s1904_s0  ;;  %s1844_s17 = sshll.u32 %s2454_s5, 4  ;;  %s1845_s17 = int_to_ptr.vmem [resolvable:$true] %s1844_s17 }
  0x38   :  { %v685_v55 = vsel %vm684_vm13, %v683_v54, %v1894_v48  ;;  %v1899_v63 = vsel %vm693_vm1, 1.0, %v3305_v35  ;;  %vm703_vm3 = vcmp.eq.s32.totalorder %v2669_v31, %v702_v61  ;;  %vm708_vm4 = vcmp.eq.s32.totalorder %v2669_v31, %v707_v62  ;;  %s2418_s18 = scalar_lea.vmem %s1845_s17, 16  ;;  %s2422_s19 = scalar_lea.vmem %s1845_s17, 32 }
  0x39   :  { %2099 = vmatpush3.bf16.msra.mxu1 %v2594_v17  ;;  %v687_v56 = vsel %vm686_vm14, %v685_v55, %v1896_v50  ;;  %v712_v30 = vstv %s1906_s1  ;;  %v717_v32 = vstv %s1908_s30  ;;  %v722_v33 = vstv %s1910_s7  ;;  %p2419_p1 = scmp.ne.s32.totalorder %s1845_s17, %s2418_s18  ;;  %p2423_p2 = scmp.lt.s32.totalorder %s1845_s17, %s1845_s17 }
  0x3a   :  { %2100 = vmatprep.subr.bf16.mxu1 %v2602_v18  ;;  %v689_v57 = vsel %vm688_vm15, %v687_v56, %v1898_v52  ;;  %vm713_vm6 = vcmp.eq.s32.totalorder %v2669_v31, %v712_v30  ;;  %vm718_vm7 = vcmp.eq.s32.totalorder %v2669_v31, %v717_v32  ;;  %v727_v36 = vstv %s1912_s8  ;;  %p2424_p3 = scmp.lt.s32.totalorder %s2422_s19, %s2418_s18 }
  0x3b   :  { %v2703_v58 = vpack.c.bf16 %v689_v57, %v689_v57  ;;  %v1905_v37 = vsel %vm708_vm4, 1.0, %v3305_v35  ;;  %v1907_v38 = vsel %vm713_vm6, 1.0, %v3305_v35  ;;  %vm723_vm8 = vcmp.eq.s32.totalorder %v2669_v31, %v722_v33 }
  0x3c   :  { %vm728_vm10 = vcmp.eq.s32.totalorder %v2669_v31, %v727_v36  ;;  %v1909_v39 = vsel %vm718_vm7, 1.0, %v3305_v35  ;;  %v1911_v40 = vsel %vm723_vm8, 1.0, %v3305_v35  ;;  %v740_v42 = vstv %s2705_s9  ;;  %p2425_p4 = por %p2424_p3, %p2423_p2 }
  0x3d   :  { %2101 = vmatpush3.bf16.msra.mxu1 %v2602_v18  ;;  %3337 = vst [vmem:[#allocation11_spill] sm:$0xff] %v2703_v58  ;;  %787 = vxpose.xlu1.c.b16.start.end [1/1] (short) (narrow) %v2703_v58, 64  ;;  %vm741_vm1 = vcmp.eq.s32.totalorder %v2669_v31, %v740_v42  ;;  %v745_v45 = vstv %s2707_s3  ;;  %v750_v46 = vstv %s2709_s10  ;;  %v1913_v47 = vsel %vm728_vm10, 1.0, %v3305_v35 }
  0x3e   :  { %2102 = vmatprep.subr.bf16.mxu1 %v2609_v19  ;;  %v1914_v50 = vsel %vm741_vm1, 1.0, %v3305_v35  ;;  %v755_v52 = vstv %s2714_s11  ;;  %v760_v54 = vstv %s2719_s12  ;;  %v765_v55 = vstv %s2721_s2  ;;  %p2426_p5 = pnand %p2425_p4, %p2419_p1 }
  0x3f   :  { %vm756_vm4 = vcmp.eq.s32.totalorder %v2669_v31, %v755_v52  ;;  %vm761_vm6 = vcmp.eq.s32.totalorder %v2669_v31, %v760_v54  ;;  %vm766_vm7 = vcmp.eq.s32.totalorder %v2669_v31, %v765_v55  ;;  %v770_v61 = vstv %s2727_s13 }
  0x40   :  { %v1920_v60 = vsel %vm756_vm4, 1.0, %v3305_v35  ;;  %v1922_v62 = vsel %vm761_vm6, 1.0, %v3305_v35  ;;  %vm771_vm8 = vcmp.eq.s32.totalorder %v2669_v31, %v770_v61  ;;  %v3347_v58 = vunpack.c.h.bf16 %v2502_v0 }
  0x41   :  { %2103 = vmatpush3.bf16.msra.mxu1 %v2609_v19  ;;  %v1926_v32 = vsel %vm771_vm8, 1.0, %v3305_v35 }
  0x42   :  { %2112 = vmatprep.subr.bf16.mxu1 %v2616_v20 }
  0x44   :  { %2105 = vmatmul.mubr.bf16.vlgmr.msra.gmra.mrb[0].mxu1 %v2542_v8 }
  0x45   :  { %2108 = vmatprep.mubr.bf16.mxu1 %v2565_v12  ;;  %2113 = vmatpush3.bf16.msra.mxu1 %v2616_v20 }
  0x46   :  { %2114 = vmatprep.subr.bf16.mxu1 %v2623_v21 }
  0x49   :  { %2115 = vmatpush3.bf16.msra.mxu1 %v2623_v21 }
  0x4a   :  { %2116 = vmatprep.subr.bf16.mxu1 %v2630_v22 }
  0x4c   :  { %2109 = vmatmul.mubr.bf16.gmra.mrb[4].mxu1 %v2587_v16 }
  0x4d   :  { %2117 = vmatpush3.bf16.msra.mxu1 %v2630_v22 }
  0x4e   :  { %2118 = vmatprep.subr.bf16.mxu1 %v2639_v23 }
  0x51   :  { %2119 = vmatpush3.bf16.msra.mxu1 %v2639_v23 }
  0x8d   :  { %v97_v24 = vpop.trf.xlu0 }
  0x8e   :  { %2120 = vmatprep.mubr.msk.bf16.mxu1 %vm266_vm0, %v97_v24  ;;  %2168 = vmatprep.mubr.msk.bf16.mxu0 %vm266_vm0, %v97_v24  ;;  %v1903_v24 = vsel %vm703_vm3, 1.0, %v3305_v35  ;;  %vm751_vm3 = vcmp.eq.s32.totalorder %v2669_v31, %v750_v46 }
  0x8f   :  { %v1918_v57 = vsel %vm751_vm3, 1.0, %v3305_v35 }
  0x91   :  { %v2649_v25 = vpop.trf.xlu0 }
  0x92   :  { %2121 = vmatmul.mubr.msk.bf16.vlgmr.msra.gmra.mrb[8].mxu1 %vm266_vm0, %v2649_v25 }
  0x95   :  { %v2653_v26 = vpop.trf.xlu0 }
  0x96   :  { %2124 = vmatprep.mubr.msk.bf16.mxu1 %vm266_vm0, %v2653_v26 }
  0x99   :  { %v2657_v27 = vpop.trf.xlu0 }
  0x9a   :  { %2125 = vmatmul.mubr.msk.bf16.gmra.mrb[12].mxu1 %vm266_vm0, %v2657_v27 }
  0x9d   :  { %v2661_v28 = vpop.trf.xlu0 }
  0x9e   :  { %2128 = vmatprep.mubr.msk.bf16.mxu1 %vm266_vm0, %v2661_v28 }
  0xa1   :  { %v2665_v29 = vpop.trf.xlu0 }
  0xa2   :  { %2129 = vmatmul.mubr.msk.bf16.gmra.mrb[16].mxu1 %vm266_vm0, %v2665_v29 }
  0xa5   :  { %v2671_v34 = vpop.trf.xlu0 }
  0xa6   :  { %2132 = vmatprep.mubr.msk.bf16.mxu1 %vm266_vm0, %v2671_v34 }
  0xa9   :  { %v2684_v44 = vpop.trf.xlu0 }
  0xaa   :  { %2133 = vmatmul.mubr.msk.bf16.gmra.mrb[20].mxu1 %vm266_vm0, %v2684_v44 }
  0xab   :  { %2152 = vmatprep.mubr.bf16.mxu1 %v2516_v3  ;;  %v1901_v3 = vsel %vm698_vm2, 1.0, %v3305_v35  ;;  %vm746_vm2 = vcmp.eq.s32.totalorder %v2669_v31, %v745_v45 }
  0xac   :  { %v731_v41 = vsel %vm676_vm5, %v1899_v63, %v1901_v3  ;;  %v1916_v51 = vsel %vm746_vm2, 1.0, %v3305_v35  ;;  %v775_v63 = vstv %s2733_s14 }
  0xad   :  { %v732_v43 = vsel %vm678_vm9, %v731_v41, %v1903_v24  ;;  %v779_v3 = vsel %vm676_vm5, %v1914_v50, %v1916_v51  ;;  %v1924_v24 = vsel %vm766_vm7, 1.0, %v3305_v35  ;;  %vm776_vm10 = vcmp.eq.s32.totalorder %v2669_v31, %v775_v63 }
  0xae   :  { %v733_v48 = vsel %vm680_vm11, %v732_v43, %v1905_v37  ;;  %v780_v30 = vsel %vm678_vm9, %v779_v3, %v1918_v57  ;;  %v1928_v36 = vsel %vm776_vm10, 1.0, %v3305_v35  ;;  %vm803_vm5 = vcmask 64512  }
  0xaf   :  { %v734_v49 = vsel %vm682_vm12, %v733_v48, %v1907_v38  ;;  %v781_v33 = vsel %vm680_vm11, %v780_v30, %v1920_v60  ;;  %vm1448_vm9 = vcmask 261120   ;;  %vm2449_vm11 = vmmov 0  }
  0xb0   :  { %v735_v53 = vsel %vm684_vm13, %v734_v49, %v1909_v39  ;;  %v782_v37 = vsel %vm682_vm12, %v781_v33, %v1922_v62 }
  0xb1   :  { %v736_v56 = vsel %vm686_vm14, %v735_v53, %v1911_v40  ;;  %v783_v38 = vsel %vm684_vm13, %v782_v37, %v1924_v24  ;;  %vm2453_vm13 = vmmov 1  }
  0xb2   :  { %v2760_v59 = vsel %vm688_vm15, %v736_v56, %v1913_v47  ;;  %v784_v39 = vsel %vm686_vm14, %v783_v38, %v1926_v32 }
  0xb3   :  { %v2778_v40 = vsel %vm688_vm15, %v784_v39, %v1928_v36 }
 0x117   :  { %v2780_v41 = vpop.f32.mrb[0].mxu1 }
 0x118   :  { %v2782_v42 = vpop.f32.mrb[1].mxu1 }
 0x119   :  { %v2784_v43 = vpop.f32.mrb[2].mxu1 }
 0x11a   :  { %v413_v45 = vpack.c.bf16 %v2784_v43, %v2780_v41  ;;  %v2788_v46 = vpop.f32.mrb[3].mxu1 }
 0x11b   :  { %v412_v47 = vpack.c.bf16 %v2788_v46, %v2782_v42 }
 0x11d   :  { %2160 = vmatprep.subr.bf16.mxu0 %v412_v47 }
 0x11e   :  { %2161 = vmatpush3.bf16.msra.mxu0 %v412_v47 }
 0x11f   :  { %v2792_v48 = vpop.f32.mrb[4].mxu1  ;;  %2162 = vmatprep.subr.bf16.mxu0 %v413_v45 }
 0x120   :  { %v2794_v49 = vpop.f32.mrb[5].mxu1 }
 0x121   :  { %v2796_v50 = vpop.f32.mrb[6].mxu1 }
 0x122   :  { %v415_v51 = vpack.c.bf16 %v2796_v50, %v2792_v48  ;;  %v2800_v52 = vpop.f32.mrb[7].mxu1  ;;  %2163 = vmatpush3.bf16.msra.mxu0 %v413_v45  ;;  %v2884_v45 = vpack.c.bf16 %v2760_v59, %v2760_v59 }
 0x123   :  { %v414_v53 = vpack.c.bf16 %v2800_v52, %v2794_v49 }
 0x124   :  { %3338 = vst [vmem:[#allocation12_spill] sm:$0xff] %v2884_v45  ;;  %v817_v47 = vsel %vm682_vm12, %v2884_v45, 0 }
 0x125   :  { %2164 = vmatprep.subr.bf16.mxu0 %v414_v53 }
 0x126   :  { %2165 = vmatpush3.bf16.msra.mxu0 %v414_v53 }
 0x127   :  { %2166 = vmatprep.subr.bf16.mxu0 %v415_v51 }
 0x12a   :  { %2167 = vmatpush3.bf16.msra.mxu0 %v415_v51  ;;  %v795_v51 = vpop.trf.xlu1 }
 0x12b   :  { %2194 = vmatprep.subr.bf16.mxu0 %v2502_v0 }
 0x12d   :  { %2169 = vmatmul.mubr.msk.bf16.vlgmr.msra.gmra.mrb[0].mxu0 %vm266_vm0, %v2649_v25 }
 0x12e   :  { %2172 = vmatprep.mubr.msk.bf16.mxu0 %vm266_vm0, %v2653_v26  ;;  %2195 = vmatpush3.bf16.msra.mxu0 %v2502_v0  ;;  %v796_v59 = vpop.trf.xlu1 }
 0x12f   :  { %2196 = vmatprep.subr.bf16.mxu0 %v2521_v4 }
 0x132   :  { %2197 = vmatpush3.bf16.msra.mxu0 %v2521_v4  ;;  %v797_v53 = vpop.trf.xlu1 }
 0x133   :  { %2198 = vmatprep.subr.bf16.mxu0 %v2536_v7 }
 0x135   :  { %2173 = vmatmul.mubr.msk.bf16.gmra.mrb[4].mxu0 %vm266_vm0, %v2657_v27 }
 0x136   :  { %2176 = vmatprep.mubr.msk.bf16.mxu0 %vm266_vm0, %v2661_v28  ;;  %2199 = vmatpush3.bf16.msra.mxu0 %v2536_v7 }
 0x137   :  { %2200 = vmatprep.subr.bf16.mxu0 %v2560_v11 }
 0x13a   :  { %2201 = vmatpush3.bf16.msra.mxu0 %v2560_v11 }
 0x13b   :  { %2202 = vmatprep.subr.bf16.mxu0 %v2582_v15 }
 0x13d   :  { %2177 = vmatmul.mubr.msk.bf16.gmra.mrb[8].mxu0 %vm266_vm0, %v2665_v29 }
 0x13e   :  { %2180 = vmatprep.mubr.msk.bf16.mxu0 %vm266_vm0, %v2671_v34  ;;  %2203 = vmatpush3.bf16.msra.mxu0 %v2582_v15 }
 0x13f   :  { %2204 = vmatprep.subr.bf16.mxu0 %v2594_v17 }
 0x142   :  { %2205 = vmatpush3.bf16.msra.mxu0 %v2594_v17 }
 0x143   :  { %2206 = vmatprep.subr.bf16.mxu0 %v2602_v18 }
 0x145   :  { %2181 = vmatmul.mubr.msk.bf16.gmra.mrb[12].mxu0 %vm266_vm0, %v2684_v44 }
 0x146   :  { %2207 = vmatpush3.bf16.msra.mxu0 %v2602_v18 }
 0x147   :  { %2208 = vmatprep.subr.bf16.mxu0 %v2609_v19 }
 0x14a   :  { %2209 = vmatpush3.bf16.msra.mxu0 %v2609_v19 }
 0x165   :  { %v2834_v25 = vpop.f32.mrb[8].mxu1 }
 0x166   :  { %v2836_v26 = vpop.f32.mrb[9].mxu1 }
 0x167   :  { %v2838_v27 = vpop.f32.mrb[10].mxu1 }
 0x168   :  { %v417_v28 = vpack.c.bf16 %v2838_v27, %v2834_v25  ;;  %v2842_v29 = vpop.f32.mrb[11].mxu1 }
 0x169   :  { %v416_v34 = vpack.c.bf16 %v2842_v29, %v2836_v26 }
 0x16b   :  { %2136 = vmatprep.subr.bf16.mxu1 %v416_v34 }
 0x16c   :  { %2137 = vmatpush3.bf16.msra.mxu1 %v416_v34  ;;  %v3328_v34 = vunpack.c.h.bf16 %v2502_v0 }
 0x16d   :  { %v2846_v44 = vpop.f32.mrb[12].mxu1  ;;  %2138 = vmatprep.subr.bf16.mxu1 %v417_v28 }
 0x16e   :  { %v2848_v54 = vpop.f32.mrb[13].mxu1 }
 0x16f   :  { %v2850_v55 = vpop.f32.mrb[14].mxu1 }
 0x170   :  { %v419_v56 = vpack.c.bf16 %v2850_v55, %v2846_v44  ;;  %v2854_v57 = vpop.f32.mrb[15].mxu1  ;;  %2139 = vmatpush3.bf16.msra.mxu1 %v417_v28  ;;  %v798_v28 = vpop.trf.xlu1 }
 0x171   :  { %v418_v60 = vpack.c.bf16 %v2854_v57, %v2848_v54 }
 0x173   :  { %2140 = vmatprep.subr.bf16.mxu1 %v418_v60 }
 0x174   :  { %2141 = vmatpush3.bf16.msra.mxu1 %v418_v60 }
 0x175   :  { %v2858_v61 = vpop.f32.mrb[16].mxu1  ;;  %2142 = vmatprep.subr.bf16.mxu1 %v419_v56 }
 0x176   :  { %v2860_v62 = vpop.f32.mrb[17].mxu1 }
 0x177   :  { %v2862_v63 = vpop.f32.mrb[18].mxu1 }
 0x178   :  { %v421_v3 = vpack.c.bf16 %v2862_v63, %v2858_v61  ;;  %v2866_v24 = vpop.f32.mrb[19].mxu1  ;;  %2143 = vmatpush3.bf16.msra.mxu1 %v419_v56 }
 0x179   :  { %v420_v30 = vpack.c.bf16 %v2866_v24, %v2860_v62 }
 0x17b   :  { %2144 = vmatprep.subr.bf16.mxu1 %v420_v30 }
 0x17c   :  { %2145 = vmatpush3.bf16.msra.mxu1 %v420_v30 }
 0x17d   :  { %v2870_v32 = vpop.f32.mrb[20].mxu1  ;;  %2146 = vmatprep.subr.bf16.mxu1 %v421_v3 }
 0x17e   :  { %v2872_v33 = vpop.f32.mrb[21].mxu1 }
 0x17f   :  { %v2874_v36 = vpop.f32.mrb[22].mxu1 }
 0x180   :  { %v423_v37 = vpack.c.bf16 %v2874_v36, %v2870_v32  ;;  %v2878_v38 = vpop.f32.mrb[23].mxu1  ;;  %2147 = vmatpush3.bf16.msra.mxu1 %v421_v3 }
 0x181   :  { %v422_v39 = vpack.c.bf16 %v2878_v38, %v2872_v33 }
 0x183   :  { %2148 = vmatprep.subr.bf16.mxu1 %v422_v39 }
 0x184   :  { %2149 = vmatpush3.bf16.msra.mxu1 %v422_v39 }
 0x185   :  { %2150 = vmatprep.subr.bf16.mxu1 %v423_v37 }
 0x188   :  { %2151 = vmatpush3.bf16.msra.mxu1 %v423_v37 }
 0x189   :  { %2322 = vmatprep.subr.msk.bf16.mxu1 %vm682_vm12, %v2884_v45 }
 0x18b   :  { %2153 = vmatmul.mubr.bf16.vlgmr.msra.gmra.mrb[24].mxu1 %v2542_v8  ;;  %v3303_v8 = vunpack.c.l.bf16 %v2521_v4 }
 0x18c   :  { %2185 = vmatpush3.bf16.msra.mxu1 %v817_v47  ;;  %2156 = vmatprep.mubr.bf16.mxu1 %v2565_v12  ;;  %v3304_v12 = vunpack.c.l.bf16 %v2502_v0  ;;  %v397_v47 = vadd.f32 %v2842_v29, %v3328_v34 }
 0x18d   :  { %2218 = vmatprep.subr.bf16.mxu1 %v2616_v20  ;;  %v398_v56 = vadd.f32 %v2834_v25, %v3303_v8  ;;  %v3308_v8 = vunpack.c.l.bf16 %v2536_v7 }
 0x18e   :  { %v396_v60 = vadd.f32 %v2836_v26, %v3304_v12  ;;  %v3327_v12 = vunpack.c.h.bf16 %v2560_v11 }
 0x193   :  { %2157 = vmatmul.mubr.bf16.gmra.mrb[28].mxu1 %v2587_v16  ;;  %v116_v16 = vunpack.c.h.bf16 %v2521_v4 }
 0x194   :  { %2186 = vmatprep.mubr.msk.bf16.mxu1 %vm803_vm5, %v795_v51 }
 0x195   :  { %v399_v30 = vadd.f32 %v2838_v27, %v116_v16  ;;  %v3326_v27 = vunpack.c.h.bf16 %v2536_v7 }
 0x19b   :  { %2187 = vmatmul.mubr.msk.bf16.vlgmr.msra.gmra.mrb[32].mxu1 %vm803_vm5, %v796_v59 }
 0x19c   :  { %2190 = vmatprep.mubr.msk.bf16.mxu1 %vm803_vm5, %v797_v53  ;;  %2219 = vmatpush3.bf16.msra.mxu1 %v2616_v20  ;;  %v3309_v53 = vunpack.c.l.bf16 %v2560_v11 }
 0x19d   :  { %2220 = vmatprep.subr.bf16.mxu1 %v2623_v21 }
 0x19e   :  { %v402_v29 = vadd.f32 %v2846_v44, %v3309_v53 }
 0x1a0   :  { %2221 = vmatpush3.bf16.msra.mxu1 %v2623_v21 }
 0x1a1   :  { %2222 = vmatprep.subr.bf16.mxu1 %v2630_v22 }
 0x1a3   :  { %2191 = vmatmul.mubr.msk.bf16.gmra.mrb[36].mxu1 %vm803_vm5, %v798_v28 }
 0x1a4   :  { %2223 = vmatpush3.bf16.msra.mxu1 %v2630_v22 }
 0x1a5   :  { %2224 = vmatprep.subr.bf16.mxu1 %v2639_v23 }
 0x1a8   :  { %2225 = vmatpush3.bf16.msra.mxu1 %v2639_v23 }
 0x200   :  { %v2170_v3 = vpop.f32.mrb[0].mxu0 }
 0x201   :  { %v596_v37 = vadd.f32 %v2170_v3, %v398_v56  ;;  %v523_v39 = vpop.f32.mrb[1].mxu0 }
 0x202   :  { %v594_v51 = vadd.f32 %v523_v39, %v396_v60  ;;  %v2171_v59 = vpop.f32.mrb[2].mxu0 }
 0x203   :  { %v597_v25 = vadd.f32 %v2171_v59, %v399_v30  ;;  %v526_v28 = vpop.f32.mrb[3].mxu0  ;;  %v620_v35 = vmul.f32 0.33333334, %v596_v37  ;;  %v400_v30 = vadd.f32 %v2848_v54, %v3308_v8  ;;  %v403_v37 = vadd.f32 %v2850_v55, %v3327_v12 }
 0x204   :  { %v595_v26 = vadd.f32 %v526_v28, %v397_v47  ;;  %v618_v56 = vmul.f32 0.33333334, %v594_v51  ;;  %v3310_v54 = vunpack.c.l.bf16 %v2582_v15  ;;  %v3314_v55 = vunpack.c.h.bf16 %v2582_v15 }
 0x205   :  { %v621_v31 = vmul.f32 0.33333334, %v597_v25  ;;  %v401_v25 = vadd.f32 %v2854_v57, %v3326_v27 }
 0x206   :  { %v619_v3 = vmul.f32 0.33333334, %v595_v26 }
 0x207   :  { %v2924_v60 = vpack.c.bf16 %v621_v31, %v620_v35  ;;  %v3311_v35 = vunpack.c.l.bf16 %v2594_v17 }
 0x208   :  { %v2929_v39 = vpack.c.bf16 %v619_v3, %v618_v56  ;;  %v2174_v47 = vpop.f32.mrb[4].mxu0  ;;  %v3325_v3 = vunpack.c.h.bf16 %v2594_v17 }
 0x209   :  { %v600_v59 = vadd.f32 %v2174_v47, %v402_v29  ;;  %v539_v51 = vpop.f32.mrb[5].mxu0  ;;  %v406_v57 = vadd.f32 %v2858_v61, %v3311_v35 }
 0x20a   :  { %v598_v44 = vadd.f32 %v539_v51, %v400_v30  ;;  %v2175_v31 = vpop.f32.mrb[6].mxu0 }
 0x20b   :  { %v601_v28 = vadd.f32 %v2175_v31, %v403_v37  ;;  %v542_v26 = vpop.f32.mrb[7].mxu0  ;;  %v624_v8 = vmul.f32 0.33333334, %v600_v59  ;;  %v404_v37 = vadd.f32 %v2860_v62, %v3310_v54  ;;  %v407_v59 = vadd.f32 %v2862_v63, %v3325_v3 }
 0x20c   :  { %v599_v56 = vadd.f32 %v542_v26, %v401_v25  ;;  %v622_v29 = vmul.f32 0.33333334, %v598_v44  ;;  %v3313_v62 = vunpack.c.l.bf16 %v2602_v18  ;;  %v3323_v63 = vunpack.c.h.bf16 %v2602_v18 }
 0x20d   :  { %v625_v53 = vmul.f32 0.33333334, %v601_v28  ;;  %v405_v28 = vadd.f32 %v2866_v24, %v3314_v55 }
 0x20e   :  { %v623_v47 = vmul.f32 0.33333334, %v599_v56 }
 0x20f   :  { %v2944_v30 = vpack.c.bf16 %v625_v53, %v624_v8  ;;  %v3312_v53 = vunpack.c.l.bf16 %v2609_v19 }
 0x210   :  { %v2949_v51 = vpack.c.bf16 %v623_v47, %v622_v29  ;;  %v2178_v25 = vpop.f32.mrb[8].mxu0  ;;  %v3324_v47 = vunpack.c.h.bf16 %v2609_v19 }
 0x211   :  { %v604_v31 = vadd.f32 %v2178_v25, %v406_v57  ;;  %v555_v44 = vpop.f32.mrb[9].mxu0  ;;  %v410_v24 = vadd.f32 %v2870_v32, %v3312_v53 }
 0x212   :  { %v602_v61 = vadd.f32 %v555_v44, %v404_v37  ;;  %v2179_v8 = vpop.f32.mrb[10].mxu0 }
 0x213   :  { %v605_v26 = vadd.f32 %v2179_v8, %v407_v59  ;;  %v558_v56 = vpop.f32.mrb[11].mxu0  ;;  %v628_v54 = vmul.f32 0.33333334, %v604_v31  ;;  %v408_v59 = vadd.f32 %v2872_v33, %v3313_v62  ;;  %v411_v31 = vadd.f32 %v2874_v36, %v3324_v47 }
 0x214   :  { %v603_v29 = vadd.f32 %v558_v56, %v405_v28  ;;  %v626_v57 = vmul.f32 0.33333334, %v602_v61  ;;  %v3321_v36 = vunpack.c.l.bf16 %v2623_v21 }
 0x215   :  { %v629_v35 = vmul.f32 0.33333334, %v605_v26  ;;  %v409_v26 = vadd.f32 %v2878_v38, %v3323_v63  ;;  %v3318_v38 = vunpack.c.h.bf16 %v2616_v20 }
 0x216   :  { %v627_v25 = vmul.f32 0.33333334, %v603_v29 }
 0x217   :  { %v2964_v37 = vpack.c.bf16 %v629_v35, %v628_v54 }
 0x218   :  { %v2969_v44 = vpack.c.bf16 %v627_v25, %v626_v57  ;;  %v2182_v28 = vpop.f32.mrb[12].mxu0 }
 0x219   :  { %v608_v8 = vadd.f32 %v2182_v28, %v410_v24  ;;  %v571_v61 = vpop.f32.mrb[13].mxu0  ;;  %v3315_v24 = vunpack.c.l.bf16 %v2616_v20  ;;  %v3320_v28 = vunpack.c.h.bf16 %v2623_v21 }
 0x21a   :  { %v606_v32 = vadd.f32 %v571_v61, %v408_v59  ;;  %v2183_v35 = vpop.f32.mrb[14].mxu0  ;;  %v390_v59 = vadd.f32 %v2780_v41, %v3321_v36 }
 0x21b   :  { %v609_v54 = vadd.f32 %v2183_v35, %v411_v31  ;;  %v574_v56 = vpop.f32.mrb[15].mxu0  ;;  %v632_v53 = vmul.f32 0.33333334, %v608_v8  ;;  %v388_v31 = vadd.f32 %v2782_v42, %v3315_v24  ;;  %v391_v8 = vadd.f32 %v2784_v43, %v3320_v28 }
 0x21c   :  { %v607_v29 = vadd.f32 %v574_v56, %v409_v26  ;;  %v630_v57 = vmul.f32 0.33333334, %v606_v32  ;;  %v389_v32 = vadd.f32 %v2788_v46, %v3318_v38  ;;  %v3316_v56 = vunpack.c.l.bf16 %v2639_v23 }
 0x21d   :  { %v633_v33 = vmul.f32 0.33333334, %v609_v54  ;;  %v3322_v43 = vunpack.c.h.bf16 %v2630_v22 }
 0x21e   :  { %v631_v25 = vmul.f32 0.33333334, %v607_v29  ;;  %v394_v46 = vadd.f32 %v2792_v48, %v3316_v56 }
 0x21f   :  { %v2977_v62 = vpack.c.bf16 %v633_v33, %v632_v53  ;;  %v3317_v33 = vunpack.c.l.bf16 %v2630_v22 }
 0x220   :  { %v2979_v55 = vpack.c.bf16 %v631_v25, %v630_v57  ;;  %v3319_v57 = vunpack.c.h.bf16 %v2639_v23 }
 0x221   :  { %3339 = vst [vmem:[#allocation13_spill] sm:$0xff] %v2977_v62 }
 0x25e   :  { %v2154_v53 = vpop.f32.mrb[24].mxu1 }
 0x25f   :  { %v588_v61 = vadd.f32 %v2154_v53, %v390_v59  ;;  %v458_v26 = vpop.f32.mrb[25].mxu1 }
 0x260   :  { %v586_v35 = vadd.f32 %v458_v26, %v388_v31  ;;  %v2155_v54 = vpop.f32.mrb[26].mxu1 }
 0x261   :  { %v589_v41 = vadd.f32 %v2155_v54, %v391_v8  ;;  %v461_v29 = vpop.f32.mrb[27].mxu1  ;;  %v612_v25 = vmul.f32 0.33333334, %v588_v61  ;;  %v392_v8 = vadd.f32 %v2794_v49, %v3317_v33  ;;  %v395_v61 = vadd.f32 %v2796_v50, %v3319_v57 }
 0x262   :  { %v587_v42 = vadd.f32 %v461_v29, %v389_v32  ;;  %v610_v59 = vmul.f32 0.33333334, %v586_v35 }
 0x263   :  { %v613_v24 = vmul.f32 0.33333334, %v589_v41  ;;  %v393_v41 = vadd.f32 %v2800_v52, %v3322_v43 }
 0x264   :  { %v611_v53 = vmul.f32 0.33333334, %v587_v42 }
 0x265   :  { %v3004_v31 = vpack.c.bf16 %v613_v24, %v612_v25 }
 0x266   :  { %v3009_v26 = vpack.c.bf16 %v611_v53, %v610_v59  ;;  %v2158_v32 = vpop.f32.mrb[28].mxu1 }
 0x267   :  { %3340 = vst [vmem:[#allocation14_spill] sm:$0xff] %v3004_v31  ;;  %v592_v54 = vadd.f32 %v2158_v32, %v394_v46  ;;  %v474_v35 = vpop.f32.mrb[29].mxu1 }
 0x268   :  { %3341 = vst [vmem:[#allocation15_spill] sm:$0xff] %v3009_v26  ;;  %v590_v48 = vadd.f32 %v474_v35, %v392_v8  ;;  %v2159_v24 = vpop.f32.mrb[30].mxu1 }
 0x269   :  { %v593_v29 = vadd.f32 %v2159_v24, %v395_v61  ;;  %v477_v42 = vpop.f32.mrb[31].mxu1  ;;  %v616_v56 = vmul.f32 0.33333334, %v592_v54 }
 0x26a   :  { %v591_v25 = vadd.f32 %v477_v42, %v393_v41  ;;  %v614_v59 = vmul.f32 0.33333334, %v590_v48 }
 0x26b   :  { %v617_v49 = vmul.f32 0.33333334, %v593_v29 }
 0x26c   :  { %v615_v53 = vmul.f32 0.33333334, %v591_v25 }
 0x26d   :  { %v3017_v33 = vpack.c.bf16 %v617_v49, %v616_v56 }
 0x26e   :  { %v3019_v38 = vpack.c.bf16 %v615_v53, %v614_v59  ;;  %v2188_v50 = vpop.f32.mrb[32].mxu1 }
 0x26f   :  { %3342 = vst [vmem:[#allocation16_spill] sm:$0xff] %v3017_v33  ;;  %v886_v46 = vmin.f32 %v2188_v50, 1.0  ;;  %v853_v32 = vpop.f32.mrb[33].mxu1 }
 0x270   :  { %3343 = vst [vmem:[#allocation17_spill] sm:$0xff] %v3019_v38  ;;  %v884_v57 = vmin.f32 %v853_v32, 1.0  ;;  %v2189_v28 = vpop.f32.mrb[34].mxu1 }
 0x271   :  { %v1967_v36 = vpack.c.bf16 %v886_v46, %v886_v46  ;;  %v887_v52 = vmin.f32 %v2189_v28, 1.0  ;;  %v856_v8 = vpop.f32.mrb[35].mxu1 }
 0x272   :  { %v1965_v35 = vpack.c.bf16 %v884_v57, %v884_v57  ;;  %v885_v61 = vmin.f32 %v856_v8, 1.0 }
 0x273   :  { %v926_v41 = vmul.bf16 %v1967_v36, %v2526_v5  ;;  %v1968_v54 = vpack.c.bf16 %v887_v52, %v887_v52 }
 0x274   :  { %v924_v48 = vmul.bf16 %v1965_v35, %v2507_v1  ;;  %v1966_v24 = vpack.c.bf16 %v885_v61, %v885_v61 }
 0x275   :  { %v927_v56 = vmul.bf16 %v1968_v54, %v2531_v6  ;;  %v934_v25 = vsub.bf16 %v2526_v5, %v926_v41 }
 0x276   :  { %v925_v29 = vmul.bf16 %v1966_v24, %v2512_v2  ;;  %v2192_v42 = vpop.f32.mrb[36].mxu1  ;;  %v932_v57 = vsub.bf16 %v2507_v1, %v924_v48 }
 0x277   :  { %v935_v49 = vsub.bf16 %v2531_v6, %v927_v56  ;;  %v890_v59 = vmin.f32 %v2192_v42, 1.0  ;;  %v869_v28 = vpop.f32.mrb[37].mxu1 }
 0x278   :  { %v933_v53 = vsub.bf16 %v2512_v2, %v925_v29  ;;  %v888_v36 = vmin.f32 %v869_v28, 1.0  ;;  %v2193_v50 = vpop.f32.mrb[38].mxu1 }
 0x279   :  { %v3029_v46 = vcombine.low %v934_v25, %v935_v49  ;;  %v1971_v32 = vpack.c.bf16 %v890_v59, %v890_v59  ;;  %v891_v52 = vmin.f32 %v2193_v50, 1.0  ;;  %v872_v8 = vpop.f32.mrb[39].mxu1 }
 0x27a   :  { %v1969_v35 = vpack.c.bf16 %v888_v36, %v888_v36  ;;  %v889_v61 = vmin.f32 %v872_v8, 1.0  ;;  %v1941_v54 = vcombine.low %v932_v57, %v933_v53 }
 0x27b   :  { %v930_v5 = vmul.bf16 %v1971_v32, %v2571_v13  ;;  %v1972_v41 = vpack.c.bf16 %v891_v52, %v891_v52 }
 0x27c   :  { %v928_v6 = vmul.bf16 %v1969_v35, %v2548_v9  ;;  %v1970_v24 = vpack.c.bf16 %v889_v61, %v889_v61  ;;  %964 = vxpose.xlu1.c.b16.start [1/4] (short) %v1941_v54, 128  ;;  %2210 = vmatprep.mubr.bf16.mxu0 %v1941_v54 }
 0x27d   :  { %v931_v1 = vmul.bf16 %v1972_v41, %v2576_v14  ;;  %2211 = vmatmul.mubr.bf16.vlgmr.msra.gmra.mrb[16].mxu0 %v3029_v46  ;;  %v938_v48 = vsub.bf16 %v2571_v13, %v930_v5 }
 0x27e   :  { %v929_v2 = vmul.bf16 %v1970_v24, %v2553_v10  ;;  %v936_v29 = vsub.bf16 %v2548_v9, %v928_v6 }
 0x27f   :  { %v939_v56 = vsub.bf16 %v2576_v14, %v931_v1  ;;  %v3344_v1 = vmov 0.0  }
 0x280   :  { %v937_v42 = vsub.bf16 %v2553_v10, %v929_v2  ;;  %965 = vxpose.xlu1.c.b16.cont [2/4] (short) %v3029_v46, 128 }
 0x281   :  { %v3041_v25 = vcombine.low %v938_v48, %v939_v56 }
 0x282   :  { %v3043_v49 = vcombine.low %v936_v29, %v937_v42 }
 0x284   :  { %966 = vxpose.xlu1.c.b16.cont [3/4] (short) %v3043_v49, 128  ;;  %2214 = vmatprep.mubr.bf16.mxu0 %v3043_v49 }
 0x285   :  { %2215 = vmatmul.mubr.bf16.gmra.mrb[20].mxu0 %v3041_v25 }
 0x286   :  { %2258 = vmatprep.mubr.bf16.mxu0 %v1941_v54 }
 0x288   :  { %967 = vxpose.xlu1.c.b16.end [4/4] (short) %v3041_v25, 128 }
 0x2e2   :  { %v972_v13 = vpop.trf.xlu1 }
 0x2e3   :  { %2226 = vmatprep.mubr.msk.bf16.mxu1 %vm266_vm0, %v972_v13 }
 0x2e6   :  { %v973_v9 = vpop.trf.xlu1 }
 0x2e7   :  { %2227 = vmatmul.mubr.msk.bf16.vlgmr.msra.gmra.mrb[40].mxu1 %vm266_vm0, %v973_v9 }
 0x2ea   :  { %v974_v10 = vpop.trf.xlu1 }
 0x2eb   :  { %2230 = vmatprep.mubr.msk.bf16.mxu1 %vm266_vm0, %v974_v10 }
 0x2ee   :  { %v975_v14 = vpop.trf.xlu1 }
 0x2ef   :  { %2231 = vmatmul.mubr.msk.bf16.gmra.mrb[44].mxu1 %vm266_vm0, %v975_v14 }
 0x2f2   :  { %v976_v59 = vpop.trf.xlu1 }
 0x2f3   :  { %2234 = vmatprep.mubr.msk.bf16.mxu1 %vm266_vm0, %v976_v59 }
 0x2f6   :  { %v977_v28 = vpop.trf.xlu1 }
 0x2f7   :  { %2235 = vmatmul.mubr.msk.bf16.gmra.mrb[48].mxu1 %vm266_vm0, %v977_v28 }
 0x2fa   :  { %v978_v57 = vpop.trf.xlu1 }
 0x2fb   :  { %2238 = vmatprep.mubr.msk.bf16.mxu1 %vm266_vm0, %v978_v57 }
 0x2fe   :  { %v979_v53 = vpop.trf.xlu1 }
 0x2ff   :  { %2239 = vmatmul.mubr.msk.bf16.gmra.mrb[52].mxu1 %vm266_vm0, %v979_v53 }
 0x300   :  { %2274 = vmatprep.mubr.msk.bf16.mxu1 %vm266_vm0, %v972_v13 }
 0x350   :  { %v3058_v36 = vpop.f32.mrb[16].mxu0 }
 0x351   :  { %v3060_v50 = vpop.f32.mrb[17].mxu0 }
 0x352   :  { %v3062_v32 = vpop.f32.mrb[18].mxu0 }
 0x353   :  { %v1191_v52 = vpack.c.bf16 %v3062_v32, %v3058_v36  ;;  %v3066_v8 = vpop.f32.mrb[19].mxu0 }
 0x354   :  { %v1190_v35 = vpack.c.bf16 %v3066_v8, %v3060_v50 }
 0x356   :  { %2266 = vmatprep.subr.bf16.mxu1 %v1190_v35 }
 0x357   :  { %2267 = vmatpush3.bf16.msra.mxu1 %v1190_v35 }
 0x358   :  { %v3070_v61 = vpop.f32.mrb[20].mxu0  ;;  %2268 = vmatprep.subr.bf16.mxu1 %v1191_v52 }
 0x359   :  { %v3072_v54 = vpop.f32.mrb[21].mxu0 }
 0x35a   :  { %v3074_v5 = vpop.f32.mrb[22].mxu0 }
 0x35b   :  { %v1193_v41 = vpack.c.bf16 %v3074_v5, %v3070_v61  ;;  %v3078_v6 = vpop.f32.mrb[23].mxu0  ;;  %2269 = vmatpush3.bf16.msra.mxu1 %v1191_v52 }
 0x35c   :  { %v1192_v24 = vpack.c.bf16 %v3078_v6, %v3072_v54 }
 0x35e   :  { %2270 = vmatprep.subr.bf16.mxu1 %v1192_v24 }
 0x35f   :  { %2271 = vmatpush3.bf16.msra.mxu1 %v1192_v24 }
 0x360   :  { %2272 = vmatprep.subr.bf16.mxu1 %v1193_v41 }
 0x363   :  { %2273 = vmatpush3.bf16.msra.mxu1 %v1193_v41 }
 0x364   :  { %2302 = vmatprep.subr.bf16.mxu1 %v3344_v1 }
 0x366   :  { %2275 = vmatmul.mubr.msk.bf16.vlgmr.msra.gmra.mrb[56].mxu1 %vm266_vm0, %v973_v9 }
 0x367   :  { %2278 = vmatprep.mubr.msk.bf16.mxu1 %vm266_vm0, %v974_v10 }
 0x36e   :  { %2279 = vmatmul.mubr.msk.bf16.gmra.mrb[60].mxu1 %vm266_vm0, %v975_v14 }
 0x36f   :  { %2282 = vmatprep.mubr.msk.bf16.mxu1 %vm266_vm0, %v976_v59 }
 0x376   :  { %2283 = vmatmul.mubr.msk.bf16.gmra.mrb[64].mxu1 %vm266_vm0, %v977_v28 }
 0x377   :  { %2286 = vmatprep.mubr.msk.bf16.mxu1 %vm266_vm0, %v978_v57 }
 0x37e   :  { %2287 = vmatmul.mubr.msk.bf16.gmra.mrb[68].mxu1 %vm266_vm0, %v979_v53 }
 0x37f   :  { %2318 = vmatprep.mubr.msk.bf16.mxu1 %vm2449_vm11, %v3344_v1 }
 0x3ba   :  { %v2228_v2 = vpop.f32.mrb[40].mxu1 }
 0x3bb   :  { %v1103_v48 = vpop.f32.mrb[41].mxu1 }
 0x3bc   :  { %v2229_v56 = vpop.f32.mrb[42].mxu1 }
 0x3bd   :  { %v1195_v29 = vpack.c.bf16 %v2229_v56, %v2228_v2  ;;  %v1106_v42 = vpop.f32.mrb[43].mxu1 }
 0x3be   :  { %v1194_v13 = vpack.c.bf16 %v1106_v42, %v1103_v48  ;;  %v1175_v33 = vadd.f32 %v1106_v42, %v3347_v58 }
 0x3c0   :  { %2242 = vmatprep.subr.bf16.mxu0 %v1194_v13 }
 0x3c1   :  { %2243 = vmatpush3.bf16.msra.mxu0 %v1194_v13 }
 0x3c2   :  { %v2232_v9 = vpop.f32.mrb[44].mxu1  ;;  %2244 = vmatprep.subr.bf16.mxu0 %v1195_v29 }
 0x3c3   :  { %v1119_v10 = vpop.f32.mrb[45].mxu1 }
 0x3c4   :  { %v2233_v14 = vpop.f32.mrb[46].mxu1 }
 0x3c5   :  { %v1197_v52 = vpack.c.bf16 %v2233_v14, %v2232_v9  ;;  %v1122_v59 = vpop.f32.mrb[47].mxu1  ;;  %2245 = vmatpush3.bf16.msra.mxu0 %v1195_v29 }
 0x3c6   :  { %v1196_v28 = vpack.c.bf16 %v1122_v59, %v1119_v10 }
 0x3c8   :  { %2246 = vmatprep.subr.bf16.mxu0 %v1196_v28 }
 0x3c9   :  { %2247 = vmatpush3.bf16.msra.mxu0 %v1196_v28 }
 0x3ca   :  { %v3090_v57 = vpop.f32.mrb[48].mxu1  ;;  %2248 = vmatprep.subr.bf16.mxu0 %v1197_v52 }
 0x3cb   :  { %v3092_v53 = vpop.f32.mrb[49].mxu1 }
 0x3cc   :  { %v3094_v35 = vpop.f32.mrb[50].mxu1 }
 0x3cd   :  { %v1199_v41 = vpack.c.bf16 %v3094_v35, %v3090_v57  ;;  %v3098_v24 = vpop.f32.mrb[51].mxu1  ;;  %2249 = vmatpush3.bf16.msra.mxu0 %v1197_v52 }
 0x3ce   :  { %v1198_v13 = vpack.c.bf16 %v3098_v24, %v3092_v53 }
 0x3d0   :  { %2250 = vmatprep.subr.bf16.mxu0 %v1198_v13 }
 0x3d1   :  { %2251 = vmatpush3.bf16.msra.mxu0 %v1198_v13  ;;  %v3345_v13 = vunpack.c.l.bf16 %v2521_v4  ;;  %v3349_v4 = vunpack.c.l.bf16 %v2536_v7 }
 0x3d2   :  { %v3102_v29 = vpop.f32.mrb[52].mxu1  ;;  %2252 = vmatprep.subr.bf16.mxu0 %v1199_v41 }
 0x3d3   :  { %v3104_v28 = vpop.f32.mrb[53].mxu1  ;;  %v1176_v3 = vadd.f32 %v2228_v2, %v3345_v13 }
 0x3d4   :  { %v3106_v43 = vpop.f32.mrb[54].mxu1 }
 0x3d5   :  { %v1201_v63 = vpack.c.bf16 %v3106_v43, %v3102_v29  ;;  %v3110_v47 = vpop.f32.mrb[55].mxu1  ;;  %2253 = vmatpush3.bf16.msra.mxu0 %v1199_v41  ;;  %v3346_v41 = vunpack.c.l.bf16 %v2502_v0  ;;  %v3350_v0 = vunpack.c.h.bf16 %v2560_v11 }
 0x3d6   :  { %v1200_v52 = vpack.c.bf16 %v3110_v47, %v3104_v28 }
 0x3d7   :  { %v1174_v27 = vadd.f32 %v1103_v48, %v3346_v41  ;;  %v3348_v48 = vunpack.c.l.bf16 %v2560_v11  ;;  %v1181_v58 = vadd.f32 %v2233_v14, %v3350_v0  ;;  %v3352_v14 = vunpack.c.l.bf16 %v2594_v17 }
 0x3d8   :  { %2254 = vmatprep.subr.bf16.mxu0 %v1200_v52 }
 0x3d9   :  { %2255 = vmatpush3.bf16.msra.mxu0 %v1200_v52  ;;  %v1177_v52 = vadd.f32 %v2229_v56, %v116_v16  ;;  %v1180_v41 = vadd.f32 %v2232_v9, %v3348_v48 }
 0x3da   :  { %2256 = vmatprep.subr.bf16.mxu0 %v1201_v63 }
 0x3dd   :  { %2257 = vmatpush3.bf16.msra.mxu0 %v1201_v63 }
 0x3de   :  { %2290 = vmatprep.subr.bf16.mxu0 %v3344_v1 }
 0x3e0   :  { %2259 = vmatmul.mubr.bf16.vlgmr.msra.gmra.mrb[24].mxu0 %v3029_v46 }
 0x3e1   :  { %2262 = vmatprep.mubr.bf16.mxu0 %v3043_v49 }
 0x3e8   :  { %2263 = vmatmul.mubr.bf16.gmra.mrb[28].mxu0 %v3041_v25 }
 0x3e9   :  { %2298 = vmatprep.mubr.msk.bf16.mxu0 %vm2449_vm11, %v3344_v1 }
 0x439   :  { %v2276_v12 = vpop.f32.mrb[56].mxu1 }
 0x43a   :  { %v1374_v34 = vadd.f32 %v2276_v12, %v1176_v3  ;;  %v1301_v63 = vpop.f32.mrb[57].mxu1  ;;  %v1178_v12 = vadd.f32 %v1119_v10, %v3349_v4 }
 0x43b   :  { %v1372_v46 = vadd.f32 %v1301_v63, %v1174_v27  ;;  %v2277_v38 = vpop.f32.mrb[58].mxu1  ;;  %v1184_v63 = vadd.f32 %v3090_v57, %v3352_v14 }
 0x43c   :  { %v1375_v49 = vadd.f32 %v2277_v38, %v1177_v52  ;;  %v1304_v31 = vpop.f32.mrb[59].mxu1  ;;  %v1398_v26 = vmul.f32 0.33333334, %v1374_v34  ;;  %v3351_v38 = vunpack.c.h.bf16 %v2536_v7 }
 0x43d   :  { %v1373_v25 = vadd.f32 %v1304_v31, %v1175_v33  ;;  %v1396_v2 = vmul.f32 0.33333334, %v1372_v46  ;;  %v3353_v46 = vunpack.c.l.bf16 %v2582_v15 }
 0x43e   :  { %v1399_v45 = vmul.f32 0.33333334, %v1375_v49  ;;  %v1179_v33 = vadd.f32 %v1122_v59, %v3351_v38 }
 0x43f   :  { %v1397_v13 = vmul.f32 0.33333334, %v1373_v25  ;;  %v1182_v7 = vadd.f32 %v3092_v53, %v3353_v46  ;;  %v3354_v25 = vunpack.c.h.bf16 %v2594_v17  ;;  %v3356_v17 = vunpack.c.l.bf16 %v2609_v19 }
 0x440   :  { %v1429_v62 = vpack.c.bf16 %v1399_v45, %v1398_v26 }
 0x441   :  { %v1428_v16 = vpack.c.bf16 %v1397_v13, %v1396_v2  ;;  %v2280_v3 = vpop.f32.mrb[60].mxu1  ;;  %v1185_v2 = vadd.f32 %v3094_v35, %v3354_v25  ;;  %v1188_v35 = vadd.f32 %v3102_v29, %v3356_v17 }
 0x442   :  { %v1378_v27 = vadd.f32 %v2280_v3, %v1180_v41  ;;  %1523 = vrot.lane.b32.xlu1 %v1429_v62, %s2448_s15  ;;  %v1317_v34 = vpop.f32.mrb[61].mxu1  ;;  %v3355_v41 = vunpack.c.h.bf16 %v2582_v15 }
 0x443   :  { %v1376_v31 = vadd.f32 %v1317_v34, %v1178_v12  ;;  %1521 = vrot.lane.b32.xlu0 %v1428_v16, %s2448_s15  ;;  %v2281_v45 = vpop.f32.mrb[62].mxu1 }
 0x444   :  { %v1379_v26 = vadd.f32 %v2281_v45, %v1181_v58  ;;  %v1320_v56 = vpop.f32.mrb[63].mxu1  ;;  %v1402_v9 = vmul.f32 0.33333334, %v1378_v27  ;;  %v1183_v4 = vadd.f32 %v3098_v24, %v3355_v41  ;;  %v3357_v24 = vunpack.c.l.bf16 %v2602_v18 }
 0x445   :  { %v1377_v42 = vadd.f32 %v1320_v56, %v1179_v33  ;;  %v1400_v52 = vmul.f32 0.33333334, %v1376_v31  ;;  %v3358_v45 = vunpack.c.h.bf16 %v2609_v19 }
 0x446   :  { %v1403_v10 = vmul.f32 0.33333334, %v1379_v26  ;;  %v1186_v38 = vadd.f32 %v3104_v28, %v3357_v24 }
 0x447   :  { %v1401_v11 = vmul.f32 0.33333334, %v1377_v42  ;;  %v1189_v26 = vadd.f32 %v3106_v43, %v3358_v45 }
 0x448   :  { %v1431_v62 = vpack.c.bf16 %v1403_v10, %v1402_v9  ;;  %v3359_v9 = vunpack.c.h.bf16 %v2602_v18  ;;  %v3360_v18 = vunpack.c.l.bf16 %v2623_v21 }
 0x449   :  { %v1430_v59 = vpack.c.bf16 %v1401_v11, %v1400_v52  ;;  %v2284_v49 = vpop.f32.mrb[64].mxu1 }
 0x44a   :  { %v1382_v13 = vadd.f32 %v2284_v49, %v1184_v63  ;;  %v1333_v48 = vpop.f32.mrb[65].mxu1  ;;  %v1187_v10 = vadd.f32 %v3110_v47, %v3359_v9  ;;  %v1168_v47 = vadd.f32 %v3058_v36, %v3360_v18 }
 0x44b   :  { %v1380_v12 = vadd.f32 %v1333_v48, %v1182_v7  ;;  %1525 = vrot.lane.b32.xlu0 %v1430_v59, %s2448_s15  ;;  %v2285_v57 = vpop.f32.mrb[66].mxu1  ;;  %v3361_v59 = vunpack.c.l.bf16 %v2616_v20 }
 0x44c   :  { %v1383_v16 = vadd.f32 %v2285_v57, %v1185_v2  ;;  %v1336_v3 = vpop.f32.mrb[67].mxu1  ;;  %v1406_v53 = vmul.f32 0.33333334, %v1382_v13  ;;  %v3362_v2 = vunpack.c.h.bf16 %v2623_v21 }
 0x44d   :  { %v1381_v0 = vadd.f32 %v1336_v3, %v1183_v4  ;;  %v1404_v27 = vmul.f32 0.33333334, %v1380_v12  ;;  %v1166_v49 = vadd.f32 %v3060_v50, %v3361_v59  ;;  %v3363_v4 = vunpack.c.h.bf16 %v2616_v20 }
 0x44e   :  { %v1407_v58 = vmul.f32 0.33333334, %v1383_v16  ;;  %v1169_v13 = vadd.f32 %v3062_v32, %v3362_v2 }
 0x44f   :  { %v1405_v34 = vmul.f32 0.33333334, %v1381_v0  ;;  %1527 = vrot.lane.b32.xlu0 %v1431_v62, %s2448_s15  ;;  %v1167_v12 = vadd.f32 %v3066_v8, %v3363_v4  ;;  %v3364_v8 = vunpack.c.l.bf16 %v2639_v23 }
 0x450   :  { %v1433_v15 = vpack.c.bf16 %v1407_v58, %v1406_v53 }
 0x451   :  { %v1432_v33 = vpack.c.bf16 %v1405_v34, %v1404_v27  ;;  %v2288_v31 = vpop.f32.mrb[68].mxu1  ;;  %v1172_v34 = vadd.f32 %v3070_v61, %v3364_v8 }
 0x452   :  { %v1386_v56 = vadd.f32 %v2288_v31, %v1188_v35  ;;  %v1349_v42 = vpop.f32.mrb[69].mxu1  ;;  %v3366_v31 = vunpack.c.h.bf16 %v2639_v23 }
 0x453   :  { %v1384_v52 = vadd.f32 %v1349_v42, %v1186_v38  ;;  %1529 = vrot.lane.b32.xlu0 %v1432_v33, %s2448_s15  ;;  %v2289_v29 = vpop.f32.mrb[70].mxu1 }
 0x454   :  { %v1387_v11 = vadd.f32 %v2289_v29, %v1189_v26  ;;  %v1352_v14 = vpop.f32.mrb[71].mxu1  ;;  %v1410_v28 = vmul.f32 0.33333334, %v1386_v56  ;;  %v1173_v61 = vadd.f32 %v3074_v5, %v3366_v31  ;;  %v3367_v56 = vunpack.c.h.bf16 %v2630_v22 }
 0x455   :  { %v1385_v63 = vadd.f32 %v1352_v14, %v1187_v10  ;;  %v1408_v46 = vmul.f32 0.33333334, %v1384_v52 }
 0x456   :  { %v1411_v62 = vmul.f32 0.33333334, %v1387_v11  ;;  %v1171_v42 = vadd.f32 %v3078_v6, %v3367_v56 }
 0x457   :  { %v1409_v7 = vmul.f32 0.33333334, %v1385_v63  ;;  %1531 = vrot.lane.b32.xlu0 %v1433_v15, %s2448_s15  ;;  %v3365_v15 = vunpack.c.l.bf16 %v2630_v22 }
 0x458   :  { %v1435_v19 = vpack.c.bf16 %v1411_v62, %v1410_v28 }
 0x459   :  { %v1434_v43 = vpack.c.bf16 %v1409_v7, %v1408_v46  ;;  %v1170_v24 = vadd.f32 %v3072_v54, %v3365_v15  ;;  %v1627_v15 = vsel %vm1448_vm9, %v2924_v60, 0 }
 0x45b   :  { %1533 = vrot.lane.b32.xlu0 %v1434_v43, %s2448_s15 }
 0x45f   :  { %1535 = vrot.lane.b32.xlu0 %v1435_v19, %s2448_s15 }
 0x4b3   :  { %v2260_v25 = vpop.f32.mrb[24].mxu0 }
 0x4b4   :  { %v1366_v48 = vadd.f32 %v2260_v25, %v1168_v47  ;;  %v1236_v41 = vpop.f32.mrb[25].mxu0  ;;  %v1524_v53 = vpop.permute.xlu1 %1523  ;;  %v786_v47 = vpack.c.bf16 %v2778_v40, %v2778_v40 }
 0x4b5   :  { %v1364_v57 = vadd.f32 %v1236_v41, %v1166_v49  ;;  %v2261_v16 = vpop.f32.mrb[26].mxu0  ;;  %v1522_v3 = vpop.permute.xlu0 %1521  ;;  %v1543_v17 = vsel %vm1448_vm9, %v2924_v60, %v1524_v53  ;;  %v3369_v41 = vld [vmem:[#allocation12_spill] sm:$0xff]  ;;  %v1635_v60 = vsel %vm1448_vm9, %v2964_v37, 0 }
 0x4b6   :  { %v1367_v36 = vadd.f32 %v2261_v16, %v1169_v13  ;;  %v1539_v0 = vsel %vm1448_vm9, %v2929_v39, %v1522_v3  ;;  %v1239_v50 = vpop.f32.mrb[27].mxu0  ;;  %v1390_v21 = vmul.f32 0.33333334, %v1366_v48  ;;  %v1509_v25 = vrot.slane %v786_v47, 4  ;;  %v3368_v13 = vld [vmem:[#allocation13_spill] sm:$0xff]  ;;  %v3371_v3 = vld [vmem:[#allocation14_spill] sm:$0xff] }
 0x4b7   :  { %v1365_v58 = vadd.f32 %v1239_v50, %v1167_v12  ;;  %2303 = vmatpush3.bf16.msra.mxu1 %v1539_v0  ;;  %v1388_v27 = vmul.f32 0.33333334, %v1364_v57  ;;  %v3370_v12 = vld [vmem:[#allocation15_spill] sm:$0xff]  ;;  %v3372_v50 = vld [vmem:[#allocation17_spill] sm:$0xff] }
 0x4b8   :  { %v1391_v32 = vmul.f32 0.33333334, %v1367_v36  ;;  %2304 = vmatprep.subr.bf16.mxu1 %v3344_v1  ;;  %v1511_v4 = vsel %vm682_vm12, %v3369_v41, %v1509_v25  ;;  %v1617_v8 = vsel %vm1448_vm9, %v3370_v12, 0 }
 0x4b9   :  { %v1389_v20 = vmul.f32 0.33333334, %v1365_v58 }
 0x4ba   :  { %v1425_v35 = vpack.c.bf16 %v1391_v32, %v1390_v21  ;;  %v3373_v21 = vld [vmem:[#allocation16_spill] sm:$0xff] }
 0x4bb   :  { %v1424_v38 = vpack.c.bf16 %v1389_v20, %v1388_v27  ;;  %v2264_v33 = vpop.f32.mrb[28].mxu0  ;;  %2305 = vmatpush3.bf16.msra.mxu1 %v1543_v17  ;;  %v2450_v27 = vmov 0   ;;  %v3374_v20 = vld [vmem:[#allocation11_spill] sm:$0xff]  ;;  %v1623_v17 = vsel %vm1448_vm9, %v3373_v21, 0 }
 0x4bc   :  { %v1370_v45 = vadd.f32 %v2264_v33, %v1172_v34  ;;  %v1252_v26 = vpop.f32.mrb[29].mxu0  ;;  %2306 = vmatprep.subr.bf16.mxu1 %v3344_v1  ;;  %v1619_v34 = vsel %vm1448_vm9, %v3371_v3, 0 }
 0x4bd   :  { %v1368_v9 = vadd.f32 %v1252_v26, %v1170_v24  ;;  %v2265_v10 = vpop.f32.mrb[30].mxu0  ;;  %1440 = vrot.lane.b32.xlu1 %v1424_v38, %s2448_s15  ;;  %v1526_v54 = vpop.permute.xlu0 %1525  ;;  %v1629_v24 = vsel %vm1448_vm9, %v2949_v51, 0  ;;  %v1631_v38 = vsel %vm1448_vm9, %v2944_v30, 0 }
 0x4be   :  { %v1371_v52 = vadd.f32 %v2265_v10, %v1173_v61  ;;  %v1547_v29 = vsel %vm1448_vm9, %v2949_v51, %v1526_v54  ;;  %v1255_v23 = vpop.f32.mrb[31].mxu0  ;;  %v1394_v5 = vmul.f32 0.33333334, %v1370_v45  ;;  %v1637_v51 = vsel %vm1448_vm9, %v2979_v55, 0  ;;  %v3375_v54 = vld [vmem:[#allocation10_spill] sm:$0xff] }
 0x4bf   :  { %v1369_v11 = vadd.f32 %v1255_v23, %v1171_v42  ;;  %2307 = vmatpush3.bf16.msra.mxu1 %v1547_v29  ;;  %v1392_v63 = vmul.f32 0.33333334, %v1368_v9  ;;  %vm1694_vm12 = vcmp.lt.s32.totalorder %v3375_v54, 64 }
 0x4c0   :  { %v1395_v14 = vmul.f32 0.33333334, %v1371_v52  ;;  %2308 = vmatprep.subr.bf16.mxu1 %v3344_v1  ;;  %vm1702_vm14 = vmxor %vm1694_vm12, %vm2453_vm13 }
 0x4c1   :  { %v1393_v22 = vmul.f32 0.33333334, %v1369_v11  ;;  %1442 = vrot.lane.b32.xlu1 %v1425_v35, %s2448_s15  ;;  %v1528_v6 = vpop.permute.xlu0 %1527  ;;  %v1625_v35 = vsel %vm1448_vm9, %v2929_v39, 0  ;;  %v1633_v39 = vsel %vm1448_vm9, %v2969_v44, 0  ;;  %v2452_v11 = vmov -inf  }
 0x4c2   :  { %v1427_v28 = vpack.c.bf16 %v1395_v14, %v1394_v5  ;;  %v1551_v62 = vsel %vm1448_vm9, %v2944_v30, %v1528_v6  ;;  %v1639_v30 = vsel %vm1448_vm9, %v3368_v13, 0  ;;  %v1716_v5 = vsel %vm266_vm0, -1e+30, %v2452_v11 }
 0x4c3   :  { %v1426_v46 = vpack.c.bf16 %v1393_v22, %v1392_v63  ;;  %2309 = vmatpush3.bf16.msra.mxu1 %v1551_v62 }
 0x4c4   :  { %2310 = vmatprep.subr.bf16.mxu1 %v3344_v1 }
 0x4c5   :  { %v1530_v7 = vpop.permute.xlu0 %1529  ;;  %1444 = vrot.lane.b32.xlu1 %v1426_v46, %s2448_s15 }
 0x4c6   :  { %v1555_v19 = vsel %vm1448_vm9, %v2969_v44, %v1530_v7 }
 0x4c7   :  { %2311 = vmatpush3.bf16.msra.mxu1 %v1555_v19 }
 0x4c8   :  { %2312 = vmatprep.subr.bf16.mxu1 %v3344_v1 }
 0x4c9   :  { %v1532_v43 = vpop.permute.xlu0 %1531  ;;  %1446 = vrot.lane.b32.xlu1 %v1427_v28, %s2448_s15 }
 0x4ca   :  { %v1559_v18 = vsel %vm1448_vm9, %v2964_v37, %v1532_v43 }
 0x4cb   :  { %2313 = vmatpush3.bf16.msra.mxu1 %v1559_v18 }
 0x4cc   :  { %2314 = vmatprep.subr.bf16.mxu1 %v3344_v1 }
 0x4cd   :  { %v1534_v59 = vpop.permute.xlu0 %1533 }
 0x4ce   :  { %v1563_v49 = vsel %vm1448_vm9, %v2979_v55, %v1534_v59 }
 0x4cf   :  { %2315 = vmatpush3.bf16.msra.mxu1 %v1563_v49 }
 0x4d0   :  { %2316 = vmatprep.subr.bf16.mxu1 %v3344_v1 }
 0x4d1   :  { %v1536_v2 = vpop.permute.xlu0 %1535 }
 0x4d2   :  { %v1567_v48 = vsel %vm1448_vm9, %v3368_v13, %v1536_v2 }
 0x4d3   :  { %2317 = vmatpush3.bf16.msra.mxu1 %v1567_v48 }
 0x4d6   :  { %2319 = vmatmul.mubr.bf16.vlgmr.msra.gmra.mrb[72].mxu1 %v1511_v4 }
 0x52f   :  { %v1441_v40 = vpop.permute.xlu1 %1440 }
 0x530   :  { %v1451_v57 = vsel %vm1448_vm9, %v3370_v12, %v1441_v40 }
 0x531   :  { %2291 = vmatpush3.bf16.msra.mxu0 %v1451_v57 }
 0x532   :  { %2292 = vmatprep.subr.bf16.mxu0 %v3344_v1 }
 0x533   :  { %v1443_v16 = vpop.permute.xlu1 %1442 }
 0x534   :  { %v1455_v36 = vsel %vm1448_vm9, %v3371_v3, %v1443_v16 }
 0x535   :  { %2293 = vmatpush3.bf16.msra.mxu0 %v1455_v36 }
 0x536   :  { %2294 = vmatprep.subr.bf16.mxu0 %v3344_v1 }
 0x537   :  { %v1445_v0 = vpop.permute.xlu1 %1444 }
 0x538   :  { %v1459_v53 = vsel %vm1448_vm9, %v3372_v50, %v1445_v0 }
 0x539   :  { %2295 = vmatpush3.bf16.msra.mxu0 %v1459_v53 }
 0x53a   :  { %2296 = vmatprep.subr.bf16.mxu0 %v3344_v1  ;;  %v1621_v1 = vsel %vm1448_vm9, %v3372_v50, 0 }
 0x53b   :  { %v1447_v58 = vpop.permute.xlu1 %1446 }
 0x53c   :  { %v1463_v32 = vsel %vm1448_vm9, %v3373_v21, %v1447_v58 }
 0x53d   :  { %2297 = vmatpush3.bf16.msra.mxu0 %v1463_v32 }
 0x53e   :  { %1641 = vmatprep.subr.bf16.mxu0 %v2450_v27 }
 0x540   :  { %2299 = vmatmul.mubr.msk.bf16.vlgmr.msra.gmra.mrb[32].mxu0 %vm266_vm0, %v3374_v20 }
 0x541   :  { %1673 = vmatprep.mubr.bf16.mxu0 %v2450_v27 }
 0x546   :  { %1642 = vmatpush1.bf16.xpose.msra.mxu0 %v1617_v8 }
 0x547   :  { %1643 = vmatprep.subr.bf16.mxu0 %v2450_v27 }
 0x54e   :  { %1644 = vmatpush1.bf16.xpose.msra.mxu0 %v1619_v34 }
 0x54f   :  { %1645 = vmatprep.subr.bf16.mxu0 %v2450_v27 }
 0x556   :  { %1646 = vmatpush1.bf16.xpose.msra.mxu0 %v1621_v1 }
 0x557   :  { %1647 = vmatprep.subr.bf16.mxu0 %v2450_v27 }
 0x55e   :  { %1648 = vmatpush1.bf16.xpose.msra.mxu0 %v1623_v17 }
 0x55f   :  { %1649 = vmatprep.subr.bf16.mxu0 %v2450_v27 }
 0x566   :  { %1650 = vmatpush1.bf16.xpose.msra.mxu0 %v1625_v35 }
 0x567   :  { %1651 = vmatprep.subr.bf16.mxu0 %v2450_v27 }
 0x56e   :  { %1652 = vmatpush1.bf16.xpose.msra.mxu0 %v1627_v15 }
 0x56f   :  { %1653 = vmatprep.subr.bf16.mxu0 %v2450_v27 }
 0x576   :  { %1654 = vmatpush1.bf16.xpose.msra.mxu0 %v1629_v24 }
 0x577   :  { %1655 = vmatprep.subr.bf16.mxu0 %v2450_v27 }
 0x57e   :  { %1656 = vmatpush1.bf16.xpose.msra.mxu0 %v1631_v38 }
 0x57f   :  { %1657 = vmatprep.subr.bf16.mxu0 %v2450_v27 }
 0x586   :  { %1658 = vmatpush1.bf16.xpose.msra.mxu0 %v1633_v39 }
 0x587   :  { %1659 = vmatprep.subr.bf16.mxu0 %v2450_v27 }
 0x58e   :  { %1660 = vmatpush1.bf16.xpose.msra.mxu0 %v1635_v60 }
 0x58f   :  { %1661 = vmatprep.subr.bf16.mxu0 %v2450_v27 }
 0x596   :  { %1662 = vmatpush1.bf16.xpose.msra.mxu0 %v1637_v51 }
 0x597   :  { %1663 = vmatprep.subr.bf16.mxu0 %v2450_v27 }
 0x59e   :  { %1664 = vmatpush1.bf16.xpose.msra.mxu0 %v1639_v30 }
 0x5a9   :  { %v1603_v33 = vpop.f32.mrb[72].mxu1 }
 0x5aa   :  { %v2320_v31 = vpop.f32.mrb[73].mxu1 }
 0x5ab   :  { %v1606_v61 = vpop.f32.mrb[74].mxu1 }
 0x5ac   :  { %v2321_v44 = vpop.f32.mrb[75].mxu1 }
 0x613   :  { %v1502_v45 = vpop.f32.mrb[32].mxu0 }
 0x614   :  { %1771 = vrot.lane.b32.xlu1 %v1502_v45, %s2448_s15  ;;  %v2300_v26 = vpop.f32.mrb[33].mxu0  ;;  %v1610_v37 = vpack.c.bf16 %v1606_v61, %v1502_v45  ;;  %v1809_v56 = vmul.f32 %v1606_v61, %v1502_v45  ;;  %v1813_v42 = vmul.f32 %v1603_v33, %v1502_v45 }
 0x615   :  { %v1505_v9 = vpop.f32.mrb[34].mxu0 }
 0x616   :  { %v2301_v10 = vpop.f32.mrb[35].mxu0  ;;  %1612 = vrot.lane.b32.xlu0 %v1610_v37, %s2451_s16  ;;  %v1810_v49 = vsel %vm1448_vm9, %v1809_v56, 0.0  ;;  %v1814_v25 = vsel %vm1448_vm9, %v1813_v42, 0.0 }
 0x61a   :  { %1776 = vrot.lane.b32.xlu0 %v1606_v61, %s2448_s15 }
 0x686   :  { %v1772_v47 = vpop.permute.xlu1 %1771 }
 0x687   :  { %v1774_v59 = vmul.f32 %v1772_v47, %v1502_v45 }
 0x688   :  { %v1613_v55 = vpop.permute.xlu0 %1612 }
 0x689   :  { %1962 = vmatmul.mubr.msk.bf16.vlgmr.msra.gmra.mrb[36].mxu0 %vm1448_vm9, %v1613_v55 }
 0x68c   :  { %v1777_v43 = vpop.permute.xlu0 %1776 }
 0x68d   :  { %v1779_v18 = vmul.f32 %v1777_v43, %v1606_v61 }
 0x75c   :  { %v1675_v52 = vpop.f32.mrb[36].mxu0 }
 0x75d   :  { %v1684_v29 = vmul.f32 5.0, %v1675_v52  ;;  %v1677_v23 = vpop.f32.mrb[37].mxu0 }
 0x75e   :  { %v1679_v14 = vpop.f32.mrb[38].mxu0 }
 0x75f   :  { %v1686_v63 = vmul.f32 5.0, %v1679_v14  ;;  %v1681_v22 = vpop.f32.mrb[39].mxu0  ;;  %v1712_v6 = vsel %vm1694_vm12, %v1684_v29, -1e+30 }
 0x760   :  { %v1687_v28 = vmul.f32 5.0, %v1681_v22  ;;  %v1717_v62 = vmax.f32 %v1712_v6, %v1716_v5 }
 0x761   :  { %v1714_v46 = vsel %vm1702_vm14, %v1686_v63, -1e+30 }
 0x762   :  { %v1720_v7 = vsel %vm266_vm0, %v1687_v28, -inf  ;;  %1718 = vmax.xlane.f32.xlu1 %v1717_v62 }
 0x763   :  { %v1721_v19 = vmax.f32 %v1714_v46, %v1720_v7 }
 0x765   :  { %1722 = vmax.xlane.f32.xlu0 %v1721_v19 }
 0x773   :  { %1784 = vrot.lane.b32.xlu1 %v1779_v18, %s2451_s16 }
 0x77b   :  { %1782 = vrot.lane.b32.xlu0 %v1774_v59, %s2451_s16 }
 0x797   :  { %1811 = vadd.xlane.f32.xlu1 %v1810_v49 }
 0x79a   :  { %1815 = vadd.xlane.f32.xlu0 %v1814_v25 }
 0x7ef   :  { %v1719_v2 = vpop.xlane.xlu1 %1718 }
 0x7f0   :  { %v3268_v13 = vmax.f32 %v1719_v2, 0.0 }
 0x7f2   :  { %v1726_v48 = vsub.f32 %v1712_v6, %v3268_v13  ;;  %v1727_v41 = vsub.f32 -1e+30, %v3268_v13  ;;  %v1723_v4 = vpop.xlane.xlu0 %1722  ;;  %v1746_v30 = vsub.f32 0.0, %v3268_v13 }
 0x7f3   :  { %v3272_v40 = vmax.f32 %v1723_v4, 0.0  ;;  %v1785_v1 = vpop.permute.xlu1 %1784 }
 0x7f4   :  { %v1730_v12 = vmul.f32 1.442695, %v1726_v48  ;;  %v1732_v57 = vmul.f32 1.442695, %v1727_v41  ;;  %v1791_v35 = vsel %vm1448_vm9, %v1785_v1, 0.0 }
 0x7f5   :  { %v1728_v16 = vsub.f32 %v1714_v46, %v3272_v40  ;;  %v1729_v3 = vsub.f32 %v1687_v28, %v3272_v40  ;;  %v1747_v33 = vsub.f32 0.0, %v3272_v40  ;;  %v1748_v31 = vmul.f32 1.442695, %v1746_v30 }
 0x7f6   :  { %2362 = vpow2.f32 %v1730_v12  ;;  %v1783_v20 = vpop.permute.xlu0 %1782 }
 0x7f7   :  { %2364 = vpow2.f32 %v1732_v57  ;;  %v1734_v36 = vmul.f32 1.442695, %v1728_v16  ;;  %v1736_v0 = vmul.f32 1.442695, %v1729_v3  ;;  %v1788_v17 = vsel %vm1448_vm9, %v1783_v20, 0.0 }
 0x7f8   :  { %v1750_v61 = vmul.f32 1.442695, %v1747_v33 }
 0x7f9   :  { %2366 = vpow2.f32 %v1734_v36 }
 0x7fa   :  { %2368 = vpow2.f32 %v1736_v0 }
 0x800   :  { %v2363_v50 = vpop.eup %2362 }
 0x801   :  { %v2365_v53 = vpop.eup %2364 }
 0x802   :  { %v1738_v58 = vsel %vm266_vm0, %v2365_v53, 0.0 }
 0x803   :  { %v2367_v21 = vpop.eup %2366  ;;  %v1739_v32 = vadd.f32 %v2363_v50, %v1738_v58 }
 0x804   :  { %v2369_v27 = vpop.eup %2368 }
 0x805   :  { %1740 = vadd.xlane.f32.xlu0 %v1739_v32  ;;  %v1742_v8 = vsel %vm266_vm0, %v2369_v27, 0.0  ;;  %vm1836_vm0 = vcmask 0  }
 0x806   :  { %v1743_v34 = vadd.f32 %v2367_v21, %v1742_v8 }
 0x808   :  { %1744 = vadd.xlane.f32.xlu1 %v1743_v34 }
 0x809   :  { %1789 = vadd.xlane.f32.xlu0 %v1788_v17 }
 0x80c   :  { %1792 = vadd.xlane.f32.xlu1 %v1791_v35 }
 0x824   :  { %v1812_v24 = vpop.xlane.xlu1 %1811 }
 0x827   :  { %v1816_v15 = vpop.xlane.xlu0 %1815 }
 0x828   :  { %v1817_v38 = vsub.f32 %v1812_v24, %v1816_v15 }
 0x82a   :  { %v1819_v39 = vand.u32 2147483647, %v1817_v38  ;;  %v1818_v63 = vmax.f32 %v1817_v38, 0.0 }
 0x82c   :  { %v1820_v60 = vsub.f32 0.0, %v1819_v39 }
 0x82e   :  { %v1821_v51 = vmul.f32 1.442695, %v1820_v60 }
 0x830   :  { %2370 = vpow2.f32 %v1821_v51 }
 0x831   :  { %2372 = vpow2.f32 %v1748_v31 }
 0x832   :  { %2374 = vpow2.f32 %v1750_v61 }
 0x83a   :  { %v2371_v44 = vpop.eup %2370 }
 0x83b   :  { %v1823_v45 = vadd.f32 1.0, %v2371_v44  ;;  %v2373_v26 = vpop.eup %2372 }
 0x83c   :  { %v2375_v37 = vpop.eup %2374  ;;  %v1752_v56 = vmul.f32 1e-08, %v2373_v26 }
 0x83d   :  { %2376 = vlog2.f32 %v1823_v45  ;;  %v1753_v10 = vmul.f32 1e-08, %v2375_v37 }
 0x847   :  { %v2377_v54 = vpop.eup %2376 }
 0x848   :  { %v1825_v11 = vmul.f32 0.6931472, %v2377_v54 }
 0x84a   :  { %v1826_v28 = vadd.f32 %v1825_v11, %v1818_v63 }
 0x84c   :  { %v1827_v19 = vrot.slane %v1826_v28, 4 }
 0x84e   :  { %v1828_v49 = vadd.f32 %v1827_v19, %v1826_v28 }
 0x850   :  { %v1829_v4 = vrot.slane %v1828_v49, 2 }
 0x852   :  { %v1830_v0 = vadd.f32 %v1829_v4, %v1828_v49 }
 0x854   :  { %v1831_v21 = vrot.slane %v1830_v0, 1 }
 0x856   :  { %v1832_v8 = vadd.f32 %v1831_v21, %v1830_v0 }
 0x892   :  { %v1741_v42 = vpop.xlane.xlu0 %1740 }
 0x893   :  { %v1754_v9 = vadd.f32 %v1752_v56, %v1741_v42 }
 0x895   :  { %2378 = vlog2.f32 %v1754_v9  ;;  %v1745_v55 = vpop.xlane.xlu1 %1744 }
 0x896   :  { %v1755_v52 = vadd.f32 %v1753_v10, %v1745_v55  ;;  %v1790_v29 = vpop.xlane.xlu0 %1789 }
 0x897   :  { %v1794_v23 = vmul.f32 5.0, %v1790_v29 }
 0x898   :  { %2380 = vlog2.f32 %v1755_v52 }
 0x899   :  { %v1793_v5 = vpop.xlane.xlu1 %1792  ;;  %v1963_v22 = vclamps-f32 %v1794_v23, 5.0 }
 0x89a   :  { %v1795_v14 = vmul.f32 5.0, %v1793_v5 }
 0x89c   :  { %v1964_v6 = vclamps-f32 %v1795_v14, 5.0 }
 0x89e   :  { %v1800_v62 = vadd.f32 %v1964_v6, %v1963_v22 }
 0x89f   :  { %v2379_v46 = vpop.eup %2378 }
 0x8a0   :  { %v1801_v7 = vrot.slane %v1800_v62, 4  ;;  %v1757_v43 = vmul.f32 0.6931472, %v2379_v46 }
 0x8a2   :  { %v2381_v18 = vpop.eup %2380  ;;  %v1802_v47 = vadd.f32 %v1801_v7, %v1800_v62  ;;  %v1760_v25 = vadd.f32 %v1757_v43, %v3268_v13 }
 0x8a3   :  { %v1759_v59 = vmul.f32 0.6931472, %v2381_v18 }
 0x8a4   :  { %v1803_v48 = vrot.slane %v1802_v47, 2 }
 0x8a5   :  { %v1761_v2 = vadd.f32 %v1759_v59, %v3272_v40  ;;  %v1833_v40 = vmul.f32 0.125, %v1832_v8 }
 0x8a6   :  { %v1804_v57 = vadd.f32 %v1803_v48, %v1802_v47 }
 0x8a7   :  { %v1762_v41 = vadd.f32 %v1761_v2, %v1760_v25 }
 0x8a8   :  { %v1805_v36 = vrot.slane %v1804_v57, 1 }
 0x8a9   :  { %v1763_v12 = vrot.slane %v1762_v41, 4 }
 0x8aa   :  { %v1806_v53 = vadd.f32 %v1805_v36, %v1804_v57 }
 0x8ab   :  { %v1764_v16 = vadd.f32 %v1763_v12, %v1762_v41 }
 0x8ac   :  { %v1807_v20 = vmul.f32 0.125, %v1806_v53 }
 0x8ad   :  { %v1765_v3 = vrot.slane %v1764_v16, 2 }
 0x8af   :  { %v1766_v50 = vadd.f32 %v1765_v3, %v1764_v16 }
 0x8b1   :  { %v1767_v58 = vrot.slane %v1766_v50, 1 }
 0x8b3   :  { %v1768_v32 = vadd.f32 %v1767_v58, %v1766_v50 }
 0x8b5   :  { %v1769_v27 = vmul.f32 0.125, %v1768_v32 }
 0x8b7   :  { %v1808_v13 = vsub.f32 %v1769_v27, %v1807_v20 }
 0x8b9   :  { %v1834_v34 = vmul.f32 0.1, %v1808_v13 }
 0x8bb   :  { %v1835_v1 = vadd.f32 %v1834_v34, %v1833_v40 }
 0x8bd   :  { %1837 = vst.msk [vmem:[#allocation6] sm:$0x1] %vm1836_vm0, %v1835_v1 }
 0x8be   :  { %2429 = shalt.err (!%p2426_p5)
}
 0x8bf   :  { %s2430_s21 = scalar_lea.hbm %s3300_s6, 16 }
 0x8c0   :  { %p2431_p6 = scmp.ne.s32.totalorder %s3300_s6, %s2430_s21  ;;  %p2434_p7 = scmp.lt.u32.totalorder %s2430_s21, %s3300_s6 }
 0x8c2   :  { %p2436_p8 = pnand %p2434_p7, %p2431_p6 }
 0x8c4   :  { %2439 = shalt.err (!%p2436_p8)
}
 0x8c5   :  { %1847 = dma.vmem_to_hbm [thread:$0]  %s1845_s17, 16, %s3300_s6, [#allocation7]  }
 0x8c6   :  { %2442 = dma.done.wait [#allocation7], 16  }
 0x8c7   :  { %2443 = vsyncadd [#allocation7], 4294967280 }
 0x8c8   :  { %1851 = vsyncpa [#allocation7], 1 }

</bundles_post_ra>
